<compile_context>
chip_gen: v5e
topology: v5e:2x2
jax: 0.10.0
libtpu: 0.0.40
codegen_flags: <defaults>
</compile_context>

<pallas_src>
import math
import functools

import jax
import jax.numpy as jnp
from jax.experimental import pallas as pl
from jax.experimental.pallas import tpu as pltpu


def _gather_kernel(tok_ref, table_ref, out_ref, rows_buf, sems, *, scale, chunk_tokens):
    # tok_ref:   SMEM (N_pad,) int32   — scalar-prefetched flat token ids
    # table_ref: HBM  (V, E_pad)       — full embedding table (pl.ANY, never copied whole)
    # out_ref:   VMEM (T, E_pad)       — output block for this chunk
    # rows_buf:  VMEM (2, T, E_pad)    — double-buffered gathered rows
    # sems:      DMA semaphores (2,)   — one per buffer slot
    T = chunk_tokens
    i = pl.program_id(0)
    G = pl.num_programs(0)
    slot = i % 2

    def issue(chunk, to_slot):
        # T independent row DMAs onto one semaphore -> T copies in flight.
        for t in range(T):
            tok = tok_ref[chunk * T + t]
            pltpu.make_async_copy(
                table_ref.at[pl.ds(tok, 1), :],
                rows_buf.at[to_slot, pl.ds(t, 1), :],
                sems.at[to_slot],
            ).start()

    # Prime: issue chunk 0 into slot 0 on the first grid step.
    @pl.when(i == 0)
    def _():
        issue(0, 0)

    # Prefetch chunk i+1 into the other slot while chunk i's rows land / are stored.
    @pl.when(i + 1 < G)
    def _():
        issue(i + 1, 1 - slot)

    # Wait for this chunk's T row copies (one wait per issued copy, same shapes).
    for t in range(T):
        pltpu.make_async_copy(
            table_ref.at[pl.ds(0, 1), :],            # dummy src; wait only uses dst/sem
            rows_buf.at[slot, pl.ds(t, 1), :],
            sems.at[slot],
        ).wait()

    out_ref[...] = (rows_buf[slot].astype(jnp.float32) * scale).astype(out_ref.dtype)


def token_embedding(tokens, emb_table, *, chunk=128):
    """Gather embedding rows for `tokens` and scale by sqrt(emb_size)."""
    B, S = tokens.shape
    V, E = emb_table.shape
    N = B * S
    scale = math.sqrt(E)   # PyTorch scales by sqrt of the *original* emb_size

    # Lane-dense output: pad the embedding width up to a multiple of 128.
    # (For real models, do this padding once at parameter-init time.)
    E_pad = max(128, ((E + 127) // 128) * 128)
    table = emb_table
    if E_pad != E:
        table = jnp.pad(emb_table, ((0, 0), (0, E_pad - E)))

    flat = tokens.reshape(N).astype(jnp.int32)
    # nn.Embedding raises on OOB ids; Pallas does NOT bounds-check data-dependent
    # DMA addresses, so clamp to keep the row copy in-bounds.
    flat = jnp.clip(flat, 0, V - 1)

    # Chunk size: multiple of 8 (sublane-dense), no bigger than needed.
    if N >= chunk:
        T = chunk
    else:
        T = max(8, ((N + 7) // 8) * 8)
    G = (N + T - 1) // T
    N_pad = G * T
    if N_pad != N:
        flat = jnp.pad(flat, (0, N_pad - N))        # pad ids are 0 (valid row)

    # Explicit VMEM budget: (2,T,E_pad) row scratch + 2x (T,E_pad) output
    # double-buffers, +50% headroom (table and ids never enter VMEM).
    itemsize = jnp.dtype(emb_table.dtype).itemsize
    vmem_bytes = (2 * T * E_pad + 2 * T * E_pad) * itemsize
    vmem_limit = min(max(int(vmem_bytes * 1.5) + (1 << 20), 2 << 20), 64 << 20)

    kernel = functools.partial(_gather_kernel, scale=scale, chunk_tokens=T)

    out = pl.pallas_call(
        kernel,
        out_shape=jax.ShapeDtypeStruct((N_pad, E_pad), emb_table.dtype),
        grid_spec=pltpu.PrefetchScalarGridSpec(
            num_scalar_prefetch=1,                   # flat token ids -> SMEM
            grid=(G,),
            in_specs=[pl.BlockSpec(memory_space=pl.ANY)],   # table stays in HBM
            out_specs=pl.BlockSpec((T, E_pad), lambda i, tok: (i, 0)),
            scratch_shapes=[
                pltpu.VMEM((2, T, E_pad), emb_table.dtype),
                pltpu.SemaphoreType.DMA((2,)),
            ],
        ),
        compiler_params=pltpu.CompilerParams(
            # Must be sequential: the prime + cross-step prefetch carry state in
            # scratch; "parallel" megacore splitting would break the DMA chain.
            dimension_semantics=("arbitrary",),
            vmem_limit_bytes=vmem_limit,
        ),
    )(flat, table)

    return out[:N, :E].reshape(B, S, E)


if __name__ == "__main__":
    VOCAB = 32
    EMB = 32
    BATCH = 2
    SEQ = 8

    key = jax.random.PRNGKey(0)
    k_emb, k_tok = jax.random.split(key)

    # Deterministic parameter init: nn.Embedding default is N(0, 1).
    emb_table = jax.random.normal(k_emb, (VOCAB, EMB), dtype=jnp.float32)
    tokens = jax.random.randint(k_tok, (BATCH, SEQ), 0, VOCAB, dtype=jnp.int32)

    out = token_embedding(tokens, emb_table)
    out = jax.block_until_ready(out)

    # Sanity check against plain-JAX reference.
    ref = emb_table[tokens] * math.sqrt(EMB)
    assert out.shape == (BATCH, SEQ, EMB)
    assert jnp.allclose(out, ref, atol=1e-5, rtol=1e-5)

    print("KERNEL_OK")
</pallas_src>

<mosaic_0001>
module attributes {stable_mosaic.version = 11 : i64} {
  func.func @_gather_kernel(%arg0: i32, %arg1: memref<16xi32, #tpu.memory_space<smem>>, %arg2: memref<32x128xf32, #tpu.memory_space<any>>, %arg3: memref<16x128xf32, #tpu.memory_space<vmem>>, %arg4: memref<2x16x128xf32, #tpu.memory_space<vmem>>, %arg5: memref<2x!tpu.dma_semaphore, #tpu.memory_space<semaphore_mem>>) attributes {dimension_semantics = [#tpu.dimension_semantics<arbitrary>], iteration_bounds = array<i64: 1>, scalar_prefetch = 1 : i64, scratch_operands = 2 : i64, tpu.core_type = #tpu.core_type<tc>, window_params = [{}, {transform_indices = @transform_1, window_bounds = array<i64: 16, 128>}]} {
    %c2_i32 = arith.constant 2 : i32
    %c0_i32 = arith.constant 0 : i32
    %0 = arith.cmpi eq, %c2_i32, %c0_i32 : i32
    %c1_i32 = arith.constant 1 : i32
    %1 = arith.select %0, %c1_i32, %c2_i32 : i32
    %2 = arith.remsi %arg0, %1 : i32
    %c0_i32_0 = arith.constant 0 : i32
    %3 = arith.cmpi ne, %2, %c0_i32_0 : i32
    %c0_i32_1 = arith.constant 0 : i32
    %4 = arith.cmpi slt, %2, %c0_i32_1 : i32
    %c0_i32_2 = arith.constant 0 : i32
    %5 = arith.cmpi slt, %1, %c0_i32_2 : i32
    %6 = arith.xori %4, %5 : i1
    %7 = arith.andi %6, %3 : i1
    %8 = arith.addi %2, %1 : i32
    %9 = arith.select %7, %8, %2 : i32
    %c0_i32_3 = arith.constant 0 : i32
    %10 = arith.cmpi eq, %arg0, %c0_i32_3 : i32
    %11 = arith.extui %10 : i1 to i32
    %c0_i32_4 = arith.constant 0 : i32
    %12 = arith.cmpi ne, %11, %c0_i32_4 : i32
    scf.if %12 {
      %c0_62 = arith.constant 0 : index
      %103 = memref.load %arg1[%c0_62] : memref<16xi32, #tpu.memory_space<smem>>
      %c0_i32_63 = arith.constant 0 : i32
      %c0_i32_64 = arith.constant 0 : i32
      %c0_i32_65 = arith.constant 0 : i32
      %104 = tpu.memref_slice %arg2[%103, %c0_i32_65] : memref<32x128xf32, #tpu.memory_space<any>> -> memref<1x128xf32, #tpu.memory_space<any>>
      %c0_i32_66 = arith.constant 0 : i32
      %c0_i32_67 = arith.constant 0 : i32
      %105 = tpu.memref_slice %arg4[%c0_i32_63, %c0_i32_66, %c0_i32_67] : memref<2x16x128xf32, #tpu.memory_space<vmem>> -> memref<1x1x128xf32, #tpu.memory_space<vmem>>
      %106 = tpu.memref_squeeze %105 : memref<1x1x128xf32, #tpu.memory_space<vmem>> -> memref<1x128xf32, #tpu.memory_space<vmem>>
      %107 = tpu.memref_slice %arg5[%c0_i32_64] : memref<2x!tpu.dma_semaphore, #tpu.memory_space<semaphore_mem>> -> memref<1x!tpu.dma_semaphore, #tpu.memory_space<semaphore_mem>>
      %108 = tpu.memref_squeeze %107 : memref<1x!tpu.dma_semaphore, #tpu.memory_space<semaphore_mem>> -> memref<!tpu.dma_semaphore, #tpu.memory_space<semaphore_mem>>
      tpu.enqueue_dma source(%104 : memref<1x128xf32, #tpu.memory_space<any>>) target(%106 : memref<1x128xf32, #tpu.memory_space<vmem>>) target_semaphore(%108 : memref<!tpu.dma_semaphore, #tpu.memory_space<semaphore_mem>>)
      %c1 = arith.constant 1 : index
      %109 = memref.load %arg1[%c1] : memref<16xi32, #tpu.memory_space<smem>>
      %c0_i32_68 = arith.constant 0 : i32
      %c0_i32_69 = arith.constant 0 : i32
      %c0_i32_70 = arith.constant 0 : i32
      %110 = tpu.memref_slice %arg2[%109, %c0_i32_70] : memref<32x128xf32, #tpu.memory_space<any>> -> memref<1x128xf32, #tpu.memory_space<any>>
      %c1_i32_71 = arith.constant 1 : i32
      %c0_i32_72 = arith.constant 0 : i32
      %111 = tpu.memref_slice %arg4[%c0_i32_68, %c1_i32_71, %c0_i32_72] : memref<2x16x128xf32, #tpu.memory_space<vmem>> -> memref<1x1x128xf32, #tpu.memory_space<vmem>>
      %112 = tpu.memref_squeeze %111 : memref<1x1x128xf32, #tpu.memory_space<vmem>> -> memref<1x128xf32, #tpu.memory_space<vmem>>
      %113 = tpu.memref_slice %arg5[%c0_i32_69] : memref<2x!tpu.dma_semaphore, #tpu.memory_space<semaphore_mem>> -> memref<1x!tpu.dma_semaphore, #tpu.memory_space<semaphore_mem>>
      %114 = tpu.memref_squeeze %113 : memref<1x!tpu.dma_semaphore, #tpu.memory_space<semaphore_mem>> -> memref<!tpu.dma_semaphore, #tpu.memory_space<semaphore_mem>>
      tpu.enqueue_dma source(%110 : memref<1x128xf32, #tpu.memory_space<any>>) target(%112 : memref<1x128xf32, #tpu.memory_space<vmem>>) target_semaphore(%114 : memref<!tpu.dma_semaphore, #tpu.memory_space<semaphore_mem>>)
      %c2 = arith.constant 2 : index
      %115 = memref.load %arg1[%c2] : memref<16xi32, #tpu.memory_space<smem>>
      %c0_i32_73 = arith.constant 0 : i32
      %c0_i32_74 = arith.constant 0 : i32
      %c0_i32_75 = arith.constant 0 : i32
      %116 = tpu.memref_slice %arg2[%115, %c0_i32_75] : memref<32x128xf32, #tpu.memory_space<any>> -> memref<1x128xf32, #tpu.memory_space<any>>
      %c2_i32_76 = arith.constant 2 : i32
      %c0_i32_77 = arith.constant 0 : i32
      %117 = tpu.memref_slice %arg4[%c0_i32_73, %c2_i32_76, %c0_i32_77] : memref<2x16x128xf32, #tpu.memory_space<vmem>> -> memref<1x1x128xf32, #tpu.memory_space<vmem>>
      %118 = tpu.memref_squeeze %117 : memref<1x1x128xf32, #tpu.memory_space<vmem>> -> memref<1x128xf32, #tpu.memory_space<vmem>>
      %119 = tpu.memref_slice %arg5[%c0_i32_74] : memref<2x!tpu.dma_semaphore, #tpu.memory_space<semaphore_mem>> -> memref<1x!tpu.dma_semaphore, #tpu.memory_space<semaphore_mem>>
      %120 = tpu.memref_squeeze %119 : memref<1x!tpu.dma_semaphore, #tpu.memory_space<semaphore_mem>> -> memref<!tpu.dma_semaphore, #tpu.memory_space<semaphore_mem>>
      tpu.enqueue_dma source(%116 : memref<1x128xf32, #tpu.memory_space<any>>) target(%118 : memref<1x128xf32, #tpu.memory_space<vmem>>) target_semaphore(%120 : memref<!tpu.dma_semaphore, #tpu.memory_space<semaphore_mem>>)
      %c3 = arith.constant 3 : index
      %121 = memref.load %arg1[%c3] : memref<16xi32, #tpu.memory_space<smem>>
      %c0_i32_78 = arith.constant 0 : i32
      %c0_i32_79 = arith.constant 0 : i32
      %c0_i32_80 = arith.constant 0 : i32
      %122 = tpu.memref_slice %arg2[%121, %c0_i32_80] : memref<32x128xf32, #tpu.memory_space<any>> -> memref<1x128xf32, #tpu.memory_space<any>>
      %c3_i32_81 = arith.constant 3 : i32
      %c0_i32_82 = arith.constant 0 : i32
      %123 = tpu.memref_slice %arg4[%c0_i32_78, %c3_i32_81, %c0_i32_82] : memref<2x16x128xf32, #tpu.memory_space<vmem>> -> memref<1x1x128xf32, #tpu.memory_space<vmem>>
      %124 = tpu.memref_squeeze %123 : memref<1x1x128xf32, #tpu.memory_space<vmem>> -> memref<1x128xf32, #tpu.memory_space<vmem>>
      %125 = tpu.memref_slice %arg5[%c0_i32_79] : memref<2x!tpu.dma_semaphore, #tpu.memory_space<semaphore_mem>> -> memref<1x!tpu.dma_semaphore, #tpu.memory_space<semaphore_mem>>
      %126 = tpu.memref_squeeze %125 : memref<1x!tpu.dma_semaphore, #tpu.memory_space<semaphore_mem>> -> memref<!tpu.dma_semaphore, #tpu.memory_space<semaphore_mem>>
      tpu.enqueue_dma source(%122 : memref<1x128xf32, #tpu.memory_space<any>>) target(%124 : memref<1x128xf32, #tpu.memory_space<vmem>>) target_semaphore(%126 : memref<!tpu.dma_semaphore, #tpu.memory_space<semaphore_mem>>)
      %c4 = arith.constant 4 : index
      %127 = memref.load %arg1[%c4] : memref<16xi32, #tpu.memory_space<smem>>
      %c0_i32_83 = arith.constant 0 : i32
      %c0_i32_84 = arith.constant 0 : i32
      %c0_i32_85 = arith.constant 0 : i32
      %128 = tpu.memref_slice %arg2[%127, %c0_i32_85] : memref<32x128xf32, #tpu.memory_space<any>> -> memref<1x128xf32, #tpu.memory_space<any>>
      %c4_i32_86 = arith.constant 4 : i32
      %c0_i32_87 = arith.constant 0 : i32
      %129 = tpu.memref_slice %arg4[%c0_i32_83, %c4_i32_86, %c0_i32_87] : memref<2x16x128xf32, #tpu.memory_space<vmem>> -> memref<1x1x128xf32, #tpu.memory_space<vmem>>
      %130 = tpu.memref_squeeze %129 : memref<1x1x128xf32, #tpu.memory_space<vmem>> -> memref<1x128xf32, #tpu.memory_space<vmem>>
      %131 = tpu.memref_slice %arg5[%c0_i32_84] : memref<2x!tpu.dma_semaphore, #tpu.memory_space<semaphore_mem>> -> memref<1x!tpu.dma_semaphore, #tpu.memory_space<semaphore_mem>>
      %132 = tpu.memref_squeeze %131 : memref<1x!tpu.dma_semaphore, #tpu.memory_space<semaphore_mem>> -> memref<!tpu.dma_semaphore, #tpu.memory_space<semaphore_mem>>
      tpu.enqueue_dma source(%128 : memref<1x128xf32, #tpu.memory_space<any>>) target(%130 : memref<1x128xf32, #tpu.memory_space<vmem>>) target_semaphore(%132 : memref<!tpu.dma_semaphore, #tpu.memory_space<semaphore_mem>>)
      %c5 = arith.constant 5 : index
      %133 = memref.load %arg1[%c5] : memref<16xi32, #tpu.memory_space<smem>>
      %c0_i32_88 = arith.constant 0 : i32
      %c0_i32_89 = arith.constant 0 : i32
      %c0_i32_90 = arith.constant 0 : i32
      %134 = tpu.memref_slice %arg2[%133, %c0_i32_90] : memref<32x128xf32, #tpu.memory_space<any>> -> memref<1x128xf32, #tpu.memory_space<any>>
      %c5_i32_91 = arith.constant 5 : i32
      %c0_i32_92 = arith.constant 0 : i32
      %135 = tpu.memref_slice %arg4[%c0_i32_88, %c5_i32_91, %c0_i32_92] : memref<2x16x128xf32, #tpu.memory_space<vmem>> -> memref<1x1x128xf32, #tpu.memory_space<vmem>>
      %136 = tpu.memref_squeeze %135 : memref<1x1x128xf32, #tpu.memory_space<vmem>> -> memref<1x128xf32, #tpu.memory_space<vmem>>
      %137 = tpu.memref_slice %arg5[%c0_i32_89] : memref<2x!tpu.dma_semaphore, #tpu.memory_space<semaphore_mem>> -> memref<1x!tpu.dma_semaphore, #tpu.memory_space<semaphore_mem>>
      %138 = tpu.memref_squeeze %137 : memref<1x!tpu.dma_semaphore, #tpu.memory_space<semaphore_mem>> -> memref<!tpu.dma_semaphore, #tpu.memory_space<semaphore_mem>>
      tpu.enqueue_dma source(%134 : memref<1x128xf32, #tpu.memory_space<any>>) target(%136 : memref<1x128xf32, #tpu.memory_space<vmem>>) target_semaphore(%138 : memref<!tpu.dma_semaphore, #tpu.memory_space<semaphore_mem>>)
      %c6 = arith.constant 6 : index
      %139 = memref.load %arg1[%c6] : memref<16xi32, #tpu.memory_space<smem>>
      %c0_i32_93 = arith.constant 0 : i32
      %c0_i32_94 = arith.constant 0 : i32
      %c0_i32_95 = arith.constant 0 : i32
      %140 = tpu.memref_slice %arg2[%139, %c0_i32_95] : memref<32x128xf32, #tpu.memory_space<any>> -> memref<1x128xf32, #tpu.memory_space<any>>
      %c6_i32_96 = arith.constant 6 : i32
      %c0_i32_97 = arith.constant 0 : i32
      %141 = tpu.memref_slice %arg4[%c0_i32_93, %c6_i32_96, %c0_i32_97] : memref<2x16x128xf32, #tpu.memory_space<vmem>> -> memref<1x1x128xf32, #tpu.memory_space<vmem>>
      %142 = tpu.memref_squeeze %141 : memref<1x1x128xf32, #tpu.memory_space<vmem>> -> memref<1x128xf32, #tpu.memory_space<vmem>>
      %143 = tpu.memref_slice %arg5[%c0_i32_94] : memref<2x!tpu.dma_semaphore, #tpu.memory_space<semaphore_mem>> -> memref<1x!tpu.dma_semaphore, #tpu.memory_space<semaphore_mem>>
      %144 = tpu.memref_squeeze %143 : memref<1x!tpu.dma_semaphore, #tpu.memory_space<semaphore_mem>> -> memref<!tpu.dma_semaphore, #tpu.memory_space<semaphore_mem>>
      tpu.enqueue_dma source(%140 : memref<1x128xf32, #tpu.memory_space<any>>) target(%142 : memref<1x128xf32, #tpu.memory_space<vmem>>) target_semaphore(%144 : memref<!tpu.dma_semaphore, #tpu.memory_space<semaphore_mem>>)
      %c7 = arith.constant 7 : index
      %145 = memref.load %arg1[%c7] : memref<16xi32, #tpu.memory_space<smem>>
      %c0_i32_98 = arith.constant 0 : i32
      %c0_i32_99 = arith.constant 0 : i32
      %c0_i32_100 = arith.constant 0 : i32
      %146 = tpu.memref_slice %arg2[%145, %c0_i32_100] : memref<32x128xf32, #tpu.memory_space<any>> -> memref<1x128xf32, #tpu.memory_space<any>>
      %c7_i32_101 = arith.constant 7 : i32
      %c0_i32_102 = arith.constant 0 : i32
      %147 = tpu.memref_slice %arg4[%c0_i32_98, %c7_i32_101, %c0_i32_102] : memref<2x16x128xf32, #tpu.memory_space<vmem>> -> memref<1x1x128xf32, #tpu.memory_space<vmem>>
      %148 = tpu.memref_squeeze %147 : memref<1x1x128xf32, #tpu.memory_space<vmem>> -> memref<1x128xf32, #tpu.memory_space<vmem>>
      %149 = tpu.memref_slice %arg5[%c0_i32_99] : memref<2x!tpu.dma_semaphore, #tpu.memory_space<semaphore_mem>> -> memref<1x!tpu.dma_semaphore, #tpu.memory_space<semaphore_mem>>
      %150 = tpu.memref_squeeze %149 : memref<1x!tpu.dma_semaphore, #tpu.memory_space<semaphore_mem>> -> memref<!tpu.dma_semaphore, #tpu.memory_space<semaphore_mem>>
      tpu.enqueue_dma source(%146 : memref<1x128xf32, #tpu.memory_space<any>>) target(%148 : memref<1x128xf32, #tpu.memory_space<vmem>>) target_semaphore(%150 : memref<!tpu.dma_semaphore, #tpu.memory_space<semaphore_mem>>)
      %c8 = arith.constant 8 : index
      %151 = memref.load %arg1[%c8] : memref<16xi32, #tpu.memory_space<smem>>
      %c0_i32_103 = arith.constant 0 : i32
      %c0_i32_104 = arith.constant 0 : i32
      %c0_i32_105 = arith.constant 0 : i32
      %152 = tpu.memref_slice %arg2[%151, %c0_i32_105] : memref<32x128xf32, #tpu.memory_space<any>> -> memref<1x128xf32, #tpu.memory_space<any>>
      %c8_i32_106 = arith.constant 8 : i32
      %c0_i32_107 = arith.constant 0 : i32
      %153 = tpu.memref_slice %arg4[%c0_i32_103, %c8_i32_106, %c0_i32_107] : memref<2x16x128xf32, #tpu.memory_space<vmem>> -> memref<1x1x128xf32, #tpu.memory_space<vmem>>
      %154 = tpu.memref_squeeze %153 : memref<1x1x128xf32, #tpu.memory_space<vmem>> -> memref<1x128xf32, #tpu.memory_space<vmem>>
      %155 = tpu.memref_slice %arg5[%c0_i32_104] : memref<2x!tpu.dma_semaphore, #tpu.memory_space<semaphore_mem>> -> memref<1x!tpu.dma_semaphore, #tpu.memory_space<semaphore_mem>>
      %156 = tpu.memref_squeeze %155 : memref<1x!tpu.dma_semaphore, #tpu.memory_space<semaphore_mem>> -> memref<!tpu.dma_semaphore, #tpu.memory_space<semaphore_mem>>
      tpu.enqueue_dma source(%152 : memref<1x128xf32, #tpu.memory_space<any>>) target(%154 : memref<1x128xf32, #tpu.memory_space<vmem>>) target_semaphore(%156 : memref<!tpu.dma_semaphore, #tpu.memory_space<semaphore_mem>>)
      %c9 = arith.constant 9 : index
      %157 = memref.load %arg1[%c9] : memref<16xi32, #tpu.memory_space<smem>>
      %c0_i32_108 = arith.constant 0 : i32
      %c0_i32_109 = arith.constant 0 : i32
      %c0_i32_110 = arith.constant 0 : i32
      %158 = tpu.memref_slice %arg2[%157, %c0_i32_110] : memref<32x128xf32, #tpu.memory_space<any>> -> memref<1x128xf32, #tpu.memory_space<any>>
      %c9_i32_111 = arith.constant 9 : i32
      %c0_i32_112 = arith.constant 0 : i32
      %159 = tpu.memref_slice %arg4[%c0_i32_108, %c9_i32_111, %c0_i32_112] : memref<2x16x128xf32, #tpu.memory_space<vmem>> -> memref<1x1x128xf32, #tpu.memory_space<vmem>>
      %160 = tpu.memref_squeeze %159 : memref<1x1x128xf32, #tpu.memory_space<vmem>> -> memref<1x128xf32, #tpu.memory_space<vmem>>
      %161 = tpu.memref_slice %arg5[%c0_i32_109] : memref<2x!tpu.dma_semaphore, #tpu.memory_space<semaphore_mem>> -> memref<1x!tpu.dma_semaphore, #tpu.memory_space<semaphore_mem>>
      %162 = tpu.memref_squeeze %161 : memref<1x!tpu.dma_semaphore, #tpu.memory_space<semaphore_mem>> -> memref<!tpu.dma_semaphore, #tpu.memory_space<semaphore_mem>>
      tpu.enqueue_dma source(%158 : memref<1x128xf32, #tpu.memory_space<any>>) target(%160 : memref<1x128xf32, #tpu.memory_space<vmem>>) target_semaphore(%162 : memref<!tpu.dma_semaphore, #tpu.memory_space<semaphore_mem>>)
      %c10 = arith.constant 10 : index
      %163 = memref.load %arg1[%c10] : memref<16xi32, #tpu.memory_space<smem>>
      %c0_i32_113 = arith.constant 0 : i32
      %c0_i32_114 = arith.constant 0 : i32
      %c0_i32_115 = arith.constant 0 : i32
      %164 = tpu.memref_slice %arg2[%163, %c0_i32_115] : memref<32x128xf32, #tpu.memory_space<any>> -> memref<1x128xf32, #tpu.memory_space<any>>
      %c10_i32_116 = arith.constant 10 : i32
      %c0_i32_117 = arith.constant 0 : i32
      %165 = tpu.memref_slice %arg4[%c0_i32_113, %c10_i32_116, %c0_i32_117] : memref<2x16x128xf32, #tpu.memory_space<vmem>> -> memref<1x1x128xf32, #tpu.memory_space<vmem>>
      %166 = tpu.memref_squeeze %165 : memref<1x1x128xf32, #tpu.memory_space<vmem>> -> memref<1x128xf32, #tpu.memory_space<vmem>>
      %167 = tpu.memref_slice %arg5[%c0_i32_114] : memref<2x!tpu.dma_semaphore, #tpu.memory_space<semaphore_mem>> -> memref<1x!tpu.dma_semaphore, #tpu.memory_space<semaphore_mem>>
      %168 = tpu.memref_squeeze %167 : memref<1x!tpu.dma_semaphore, #tpu.memory_space<semaphore_mem>> -> memref<!tpu.dma_semaphore, #tpu.memory_space<semaphore_mem>>
      tpu.enqueue_dma source(%164 : memref<1x128xf32, #tpu.memory_space<any>>) target(%166 : memref<1x128xf32, #tpu.memory_space<vmem>>) target_semaphore(%168 : memref<!tpu.dma_semaphore, #tpu.memory_space<semaphore_mem>>)
      %c11 = arith.constant 11 : index
      %169 = memref.load %arg1[%c11] : memref<16xi32, #tpu.memory_space<smem>>
      %c0_i32_118 = arith.constant 0 : i32
      %c0_i32_119 = arith.constant 0 : i32
      %c0_i32_120 = arith.constant 0 : i32
      %170 = tpu.memref_slice %arg2[%169, %c0_i32_120] : memref<32x128xf32, #tpu.memory_space<any>> -> memref<1x128xf32, #tpu.memory_space<any>>
      %c11_i32_121 = arith.constant 11 : i32
      %c0_i32_122 = arith.constant 0 : i32
      %171 = tpu.memref_slice %arg4[%c0_i32_118, %c11_i32_121, %c0_i32_122] : memref<2x16x128xf32, #tpu.memory_space<vmem>> -> memref<1x1x128xf32, #tpu.memory_space<vmem>>
      %172 = tpu.memref_squeeze %171 : memref<1x1x128xf32, #tpu.memory_space<vmem>> -> memref<1x128xf32, #tpu.memory_space<vmem>>
      %173 = tpu.memref_slice %arg5[%c0_i32_119] : memref<2x!tpu.dma_semaphore, #tpu.memory_space<semaphore_mem>> -> memref<1x!tpu.dma_semaphore, #tpu.memory_space<semaphore_mem>>
      %174 = tpu.memref_squeeze %173 : memref<1x!tpu.dma_semaphore, #tpu.memory_space<semaphore_mem>> -> memref<!tpu.dma_semaphore, #tpu.memory_space<semaphore_mem>>
      tpu.enqueue_dma source(%170 : memref<1x128xf32, #tpu.memory_space<any>>) target(%172 : memref<1x128xf32, #tpu.memory_space<vmem>>) target_semaphore(%174 : memref<!tpu.dma_semaphore, #tpu.memory_space<semaphore_mem>>)
      %c12 = arith.constant 12 : index
      %175 = memref.load %arg1[%c12] : memref<16xi32, #tpu.memory_space<smem>>
      %c0_i32_123 = arith.constant 0 : i32
      %c0_i32_124 = arith.constant 0 : i32
      %c0_i32_125 = arith.constant 0 : i32
      %176 = tpu.memref_slice %arg2[%175, %c0_i32_125] : memref<32x128xf32, #tpu.memory_space<any>> -> memref<1x128xf32, #tpu.memory_space<any>>
      %c12_i32_126 = arith.constant 12 : i32
      %c0_i32_127 = arith.constant 0 : i32
      %177 = tpu.memref_slice %arg4[%c0_i32_123, %c12_i32_126, %c0_i32_127] : memref<2x16x128xf32, #tpu.memory_space<vmem>> -> memref<1x1x128xf32, #tpu.memory_space<vmem>>
      %178 = tpu.memref_squeeze %177 : memref<1x1x128xf32, #tpu.memory_space<vmem>> -> memref<1x128xf32, #tpu.memory_space<vmem>>
      %179 = tpu.memref_slice %arg5[%c0_i32_124] : memref<2x!tpu.dma_semaphore, #tpu.memory_space<semaphore_mem>> -> memref<1x!tpu.dma_semaphore, #tpu.memory_space<semaphore_mem>>
      %180 = tpu.memref_squeeze %179 : memref<1x!tpu.dma_semaphore, #tpu.memory_space<semaphore_mem>> -> memref<!tpu.dma_semaphore, #tpu.memory_space<semaphore_mem>>
      tpu.enqueue_dma source(%176 : memref<1x128xf32, #tpu.memory_space<any>>) target(%178 : memref<1x128xf32, #tpu.memory_space<vmem>>) target_semaphore(%180 : memref<!tpu.dma_semaphore, #tpu.memory_space<semaphore_mem>>)
      %c13 = arith.constant 13 : index
      %181 = memref.load %arg1[%c13] : memref<16xi32, #tpu.memory_space<smem>>
      %c0_i32_128 = arith.constant 0 : i32
      %c0_i32_129 = arith.constant 0 : i32
      %c0_i32_130 = arith.constant 0 : i32
      %182 = tpu.memref_slice %arg2[%181, %c0_i32_130] : memref<32x128xf32, #tpu.memory_space<any>> -> memref<1x128xf32, #tpu.memory_space<any>>
      %c13_i32_131 = arith.constant 13 : i32
      %c0_i32_132 = arith.constant 0 : i32
      %183 = tpu.memref_slice %arg4[%c0_i32_128, %c13_i32_131, %c0_i32_132] : memref<2x16x128xf32, #tpu.memory_space<vmem>> -> memref<1x1x128xf32, #tpu.memory_space<vmem>>
      %184 = tpu.memref_squeeze %183 : memref<1x1x128xf32, #tpu.memory_space<vmem>> -> memref<1x128xf32, #tpu.memory_space<vmem>>
      %185 = tpu.memref_slice %arg5[%c0_i32_129] : memref<2x!tpu.dma_semaphore, #tpu.memory_space<semaphore_mem>> -> memref<1x!tpu.dma_semaphore, #tpu.memory_space<semaphore_mem>>
      %186 = tpu.memref_squeeze %185 : memref<1x!tpu.dma_semaphore, #tpu.memory_space<semaphore_mem>> -> memref<!tpu.dma_semaphore, #tpu.memory_space<semaphore_mem>>
      tpu.enqueue_dma source(%182 : memref<1x128xf32, #tpu.memory_space<any>>) target(%184 : memref<1x128xf32, #tpu.memory_space<vmem>>) target_semaphore(%186 : memref<!tpu.dma_semaphore, #tpu.memory_space<semaphore_mem>>)
      %c14 = arith.constant 14 : index
      %187 = memref.load %arg1[%c14] : memref<16xi32, #tpu.memory_space<smem>>
      %c0_i32_133 = arith.constant 0 : i32
      %c0_i32_134 = arith.constant 0 : i32
      %c0_i32_135 = arith.constant 0 : i32
      %188 = tpu.memref_slice %arg2[%187, %c0_i32_135] : memref<32x128xf32, #tpu.memory_space<any>> -> memref<1x128xf32, #tpu.memory_space<any>>
      %c14_i32_136 = arith.constant 14 : i32
      %c0_i32_137 = arith.constant 0 : i32
      %189 = tpu.memref_slice %arg4[%c0_i32_133, %c14_i32_136, %c0_i32_137] : memref<2x16x128xf32, #tpu.memory_space<vmem>> -> memref<1x1x128xf32, #tpu.memory_space<vmem>>
      %190 = tpu.memref_squeeze %189 : memref<1x1x128xf32, #tpu.memory_space<vmem>> -> memref<1x128xf32, #tpu.memory_space<vmem>>
      %191 = tpu.memref_slice %arg5[%c0_i32_134] : memref<2x!tpu.dma_semaphore, #tpu.memory_space<semaphore_mem>> -> memref<1x!tpu.dma_semaphore, #tpu.memory_space<semaphore_mem>>
      %192 = tpu.memref_squeeze %191 : memref<1x!tpu.dma_semaphore, #tpu.memory_space<semaphore_mem>> -> memref<!tpu.dma_semaphore, #tpu.memory_space<semaphore_mem>>
      tpu.enqueue_dma source(%188 : memref<1x128xf32, #tpu.memory_space<any>>) target(%190 : memref<1x128xf32, #tpu.memory_space<vmem>>) target_semaphore(%192 : memref<!tpu.dma_semaphore, #tpu.memory_space<semaphore_mem>>)
      %c15 = arith.constant 15 : index
      %193 = memref.load %arg1[%c15] : memref<16xi32, #tpu.memory_space<smem>>
      %c0_i32_138 = arith.constant 0 : i32
      %c0_i32_139 = arith.constant 0 : i32
      %c0_i32_140 = arith.constant 0 : i32
      %194 = tpu.memref_slice %arg2[%193, %c0_i32_140] : memref<32x128xf32, #tpu.memory_space<any>> -> memref<1x128xf32, #tpu.memory_space<any>>
      %c15_i32_141 = arith.constant 15 : i32
      %c0_i32_142 = arith.constant 0 : i32
      %195 = tpu.memref_slice %arg4[%c0_i32_138, %c15_i32_141, %c0_i32_142] : memref<2x16x128xf32, #tpu.memory_space<vmem>> -> memref<1x1x128xf32, #tpu.memory_space<vmem>>
      %196 = tpu.memref_squeeze %195 : memref<1x1x128xf32, #tpu.memory_space<vmem>> -> memref<1x128xf32, #tpu.memory_space<vmem>>
      %197 = tpu.memref_slice %arg5[%c0_i32_139] : memref<2x!tpu.dma_semaphore, #tpu.memory_space<semaphore_mem>> -> memref<1x!tpu.dma_semaphore, #tpu.memory_space<semaphore_mem>>
      %198 = tpu.memref_squeeze %197 : memref<1x!tpu.dma_semaphore, #tpu.memory_space<semaphore_mem>> -> memref<!tpu.dma_semaphore, #tpu.memory_space<semaphore_mem>>
      tpu.enqueue_dma source(%194 : memref<1x128xf32, #tpu.memory_space<any>>) target(%196 : memref<1x128xf32, #tpu.memory_space<vmem>>) target_semaphore(%198 : memref<!tpu.dma_semaphore, #tpu.memory_space<semaphore_mem>>)
    } else {
    }
    %c1_i32_5 = arith.constant 1 : i32
    %13 = arith.addi %arg0, %c1_i32_5 : i32
    %c1_i32_6 = arith.constant 1 : i32
    %14 = arith.cmpi slt, %13, %c1_i32_6 : i32
    %15 = arith.extui %14 : i1 to i32
    %c0_i32_7 = arith.constant 0 : i32
    %16 = arith.cmpi ne, %15, %c0_i32_7 : i32
    scf.if %16 {
      %c1_i32_62 = arith.constant 1 : i32
      %103 = arith.addi %arg0, %c1_i32_62 : i32
      %c1_i32_63 = arith.constant 1 : i32
      %104 = arith.subi %c1_i32_63, %9 : i32
      %c16_i32 = arith.constant 16 : i32
      %105 = arith.muli %103, %c16_i32 : i32
      %c0_i32_64 = arith.constant 0 : i32
      %106 = arith.addi %105, %c0_i32_64 : i32
      %107 = arith.index_cast %106 : i32 to index
      %108 = memref.load %arg1[%107] : memref<16xi32, #tpu.memory_space<smem>>
      %c0_i32_65 = arith.constant 0 : i32
      %109 = tpu.memref_slice %arg2[%108, %c0_i32_65] : memref<32x128xf32, #tpu.memory_space<any>> -> memref<1x128xf32, #tpu.memory_space<any>>
      %c0_i32_66 = arith.constant 0 : i32
      %c0_i32_67 = arith.constant 0 : i32
      %110 = tpu.memref_slice %arg4[%104, %c0_i32_66, %c0_i32_67] : memref<2x16x128xf32, #tpu.memory_space<vmem>> -> memref<1x1x128xf32, #tpu.memory_space<vmem>>
      %111 = tpu.memref_squeeze %110 : memref<1x1x128xf32, #tpu.memory_space<vmem>> -> memref<1x128xf32, #tpu.memory_space<vmem>>
      %112 = tpu.memref_slice %arg5[%104] : memref<2x!tpu.dma_semaphore, #tpu.memory_space<semaphore_mem>> -> memref<1x!tpu.dma_semaphore, #tpu.memory_space<semaphore_mem>>
      %113 = tpu.memref_squeeze %112 : memref<1x!tpu.dma_semaphore, #tpu.memory_space<semaphore_mem>> -> memref<!tpu.dma_semaphore, #tpu.memory_space<semaphore_mem>>
      tpu.enqueue_dma source(%109 : memref<1x128xf32, #tpu.memory_space<any>>) target(%111 : memref<1x128xf32, #tpu.memory_space<vmem>>) target_semaphore(%113 : memref<!tpu.dma_semaphore, #tpu.memory_space<semaphore_mem>>)
      %c16_i32_68 = arith.constant 16 : i32
      %114 = arith.muli %103, %c16_i32_68 : i32
      %c1_i32_69 = arith.constant 1 : i32
      %115 = arith.addi %114, %c1_i32_69 : i32
      %116 = arith.index_cast %115 : i32 to index
      %117 = memref.load %arg1[%116] : memref<16xi32, #tpu.memory_space<smem>>
      %c0_i32_70 = arith.constant 0 : i32
      %118 = tpu.memref_slice %arg2[%117, %c0_i32_70] : memref<32x128xf32, #tpu.memory_space<any>> -> memref<1x128xf32, #tpu.memory_space<any>>
      %c1_i32_71 = arith.constant 1 : i32
      %c0_i32_72 = arith.constant 0 : i32
      %119 = tpu.memref_slice %arg4[%104, %c1_i32_71, %c0_i32_72] : memref<2x16x128xf32, #tpu.memory_space<vmem>> -> memref<1x1x128xf32, #tpu.memory_space<vmem>>
      %120 = tpu.memref_squeeze %119 : memref<1x1x128xf32, #tpu.memory_space<vmem>> -> memref<1x128xf32, #tpu.memory_space<vmem>>
      %121 = tpu.memref_slice %arg5[%104] : memref<2x!tpu.dma_semaphore, #tpu.memory_space<semaphore_mem>> -> memref<1x!tpu.dma_semaphore, #tpu.memory_space<semaphore_mem>>
      %122 = tpu.memref_squeeze %121 : memref<1x!tpu.dma_semaphore, #tpu.memory_space<semaphore_mem>> -> memref<!tpu.dma_semaphore, #tpu.memory_space<semaphore_mem>>
      tpu.enqueue_dma source(%118 : memref<1x128xf32, #tpu.memory_space<any>>) target(%120 : memref<1x128xf32, #tpu.memory_space<vmem>>) target_semaphore(%122 : memref<!tpu.dma_semaphore, #tpu.memory_space<semaphore_mem>>)
      %c16_i32_73 = arith.constant 16 : i32
      %123 = arith.muli %103, %c16_i32_73 : i32
      %c2_i32_74 = arith.constant 2 : i32
      %124 = arith.addi %123, %c2_i32_74 : i32
      %125 = arith.index_cast %124 : i32 to index
      %126 = memref.load %arg1[%125] : memref<16xi32, #tpu.memory_space<smem>>
      %c0_i32_75 = arith.constant 0 : i32
      %127 = tpu.memref_slice %arg2[%126, %c0_i32_75] : memref<32x128xf32, #tpu.memory_space<any>> -> memref<1x128xf32, #tpu.memory_space<any>>
      %c2_i32_76 = arith.constant 2 : i32
      %c0_i32_77 = arith.constant 0 : i32
      %128 = tpu.memref_slice %arg4[%104, %c2_i32_76, %c0_i32_77] : memref<2x16x128xf32, #tpu.memory_space<vmem>> -> memref<1x1x128xf32, #tpu.memory_space<vmem>>
      %129 = tpu.memref_squeeze %128 : memref<1x1x128xf32, #tpu.memory_space<vmem>> -> memref<1x128xf32, #tpu.memory_space<vmem>>
      %130 = tpu.memref_slice %arg5[%104] : memref<2x!tpu.dma_semaphore, #tpu.memory_space<semaphore_mem>> -> memref<1x!tpu.dma_semaphore, #tpu.memory_space<semaphore_mem>>
      %131 = tpu.memref_squeeze %130 : memref<1x!tpu.dma_semaphore, #tpu.memory_space<semaphore_mem>> -> memref<!tpu.dma_semaphore, #tpu.memory_space<semaphore_mem>>
      tpu.enqueue_dma source(%127 : memref<1x128xf32, #tpu.memory_space<any>>) target(%129 : memref<1x128xf32, #tpu.memory_space<vmem>>) target_semaphore(%131 : memref<!tpu.dma_semaphore, #tpu.memory_space<semaphore_mem>>)
      %c16_i32_78 = arith.constant 16 : i32
      %132 = arith.muli %103, %c16_i32_78 : i32
      %c3_i32_79 = arith.constant 3 : i32
      %133 = arith.addi %132, %c3_i32_79 : i32
      %134 = arith.index_cast %133 : i32 to index
      %135 = memref.load %arg1[%134] : memref<16xi32, #tpu.memory_space<smem>>
      %c0_i32_80 = arith.constant 0 : i32
      %136 = tpu.memref_slice %arg2[%135, %c0_i32_80] : memref<32x128xf32, #tpu.memory_space<any>> -> memref<1x128xf32, #tpu.memory_space<any>>
      %c3_i32_81 = arith.constant 3 : i32
      %c0_i32_82 = arith.constant 0 : i32
      %137 = tpu.memref_slice %arg4[%104, %c3_i32_81, %c0_i32_82] : memref<2x16x128xf32, #tpu.memory_space<vmem>> -> memref<1x1x128xf32, #tpu.memory_space<vmem>>
      %138 = tpu.memref_squeeze %137 : memref<1x1x128xf32, #tpu.memory_space<vmem>> -> memref<1x128xf32, #tpu.memory_space<vmem>>
      %139 = tpu.memref_slice %arg5[%104] : memref<2x!tpu.dma_semaphore, #tpu.memory_space<semaphore_mem>> -> memref<1x!tpu.dma_semaphore, #tpu.memory_space<semaphore_mem>>
      %140 = tpu.memref_squeeze %139 : memref<1x!tpu.dma_semaphore, #tpu.memory_space<semaphore_mem>> -> memref<!tpu.dma_semaphore, #tpu.memory_space<semaphore_mem>>
      tpu.enqueue_dma source(%136 : memref<1x128xf32, #tpu.memory_space<any>>) target(%138 : memref<1x128xf32, #tpu.memory_space<vmem>>) target_semaphore(%140 : memref<!tpu.dma_semaphore, #tpu.memory_space<semaphore_mem>>)
      %c16_i32_83 = arith.constant 16 : i32
      %141 = arith.muli %103, %c16_i32_83 : i32
      %c4_i32_84 = arith.constant 4 : i32
      %142 = arith.addi %141, %c4_i32_84 : i32
      %143 = arith.index_cast %142 : i32 to index
      %144 = memref.load %arg1[%143] : memref<16xi32, #tpu.memory_space<smem>>
      %c0_i32_85 = arith.constant 0 : i32
      %145 = tpu.memref_slice %arg2[%144, %c0_i32_85] : memref<32x128xf32, #tpu.memory_space<any>> -> memref<1x128xf32, #tpu.memory_space<any>>
      %c4_i32_86 = arith.constant 4 : i32
      %c0_i32_87 = arith.constant 0 : i32
      %146 = tpu.memref_slice %arg4[%104, %c4_i32_86, %c0_i32_87] : memref<2x16x128xf32, #tpu.memory_space<vmem>> -> memref<1x1x128xf32, #tpu.memory_space<vmem>>
      %147 = tpu.memref_squeeze %146 : memref<1x1x128xf32, #tpu.memory_space<vmem>> -> memref<1x128xf32, #tpu.memory_space<vmem>>
      %148 = tpu.memref_slice %arg5[%104] : memref<2x!tpu.dma_semaphore, #tpu.memory_space<semaphore_mem>> -> memref<1x!tpu.dma_semaphore, #tpu.memory_space<semaphore_mem>>
      %149 = tpu.memref_squeeze %148 : memref<1x!tpu.dma_semaphore, #tpu.memory_space<semaphore_mem>> -> memref<!tpu.dma_semaphore, #tpu.memory_space<semaphore_mem>>
      tpu.enqueue_dma source(%145 : memref<1x128xf32, #tpu.memory_space<any>>) target(%147 : memref<1x128xf32, #tpu.memory_space<vmem>>) target_semaphore(%149 : memref<!tpu.dma_semaphore, #tpu.memory_space<semaphore_mem>>)
      %c16_i32_88 = arith.constant 16 : i32
      %150 = arith.muli %103, %c16_i32_88 : i32
      %c5_i32_89 = arith.constant 5 : i32
      %151 = arith.addi %150, %c5_i32_89 : i32
      %152 = arith.index_cast %151 : i32 to index
      %153 = memref.load %arg1[%152] : memref<16xi32, #tpu.memory_space<smem>>
      %c0_i32_90 = arith.constant 0 : i32
      %154 = tpu.memref_slice %arg2[%153, %c0_i32_90] : memref<32x128xf32, #tpu.memory_space<any>> -> memref<1x128xf32, #tpu.memory_space<any>>
      %c5_i32_91 = arith.constant 5 : i32
      %c0_i32_92 = arith.constant 0 : i32
      %155 = tpu.memref_slice %arg4[%104, %c5_i32_91, %c0_i32_92] : memref<2x16x128xf32, #tpu.memory_space<vmem>> -> memref<1x1x128xf32, #tpu.memory_space<vmem>>
      %156 = tpu.memref_squeeze %155 : memref<1x1x128xf32, #tpu.memory_space<vmem>> -> memref<1x128xf32, #tpu.memory_space<vmem>>
      %157 = tpu.memref_slice %arg5[%104] : memref<2x!tpu.dma_semaphore, #tpu.memory_space<semaphore_mem>> -> memref<1x!tpu.dma_semaphore, #tpu.memory_space<semaphore_mem>>
      %158 = tpu.memref_squeeze %157 : memref<1x!tpu.dma_semaphore, #tpu.memory_space<semaphore_mem>> -> memref<!tpu.dma_semaphore, #tpu.memory_space<semaphore_mem>>
      tpu.enqueue_dma source(%154 : memref<1x128xf32, #tpu.memory_space<any>>) target(%156 : memref<1x128xf32, #tpu.memory_space<vmem>>) target_semaphore(%158 : memref<!tpu.dma_semaphore, #tpu.memory_space<semaphore_mem>>)
      %c16_i32_93 = arith.constant 16 : i32
      %159 = arith.muli %103, %c16_i32_93 : i32
      %c6_i32_94 = arith.constant 6 : i32
      %160 = arith.addi %159, %c6_i32_94 : i32
      %161 = arith.index_cast %160 : i32 to index
      %162 = memref.load %arg1[%161] : memref<16xi32, #tpu.memory_space<smem>>
      %c0_i32_95 = arith.constant 0 : i32
      %163 = tpu.memref_slice %arg2[%162, %c0_i32_95] : memref<32x128xf32, #tpu.memory_space<any>> -> memref<1x128xf32, #tpu.memory_space<any>>
      %c6_i32_96 = arith.constant 6 : i32
      %c0_i32_97 = arith.constant 0 : i32
      %164 = tpu.memref_slice %arg4[%104, %c6_i32_96, %c0_i32_97] : memref<2x16x128xf32, #tpu.memory_space<vmem>> -> memref<1x1x128xf32, #tpu.memory_space<vmem>>
      %165 = tpu.memref_squeeze %164 : memref<1x1x128xf32, #tpu.memory_space<vmem>> -> memref<1x128xf32, #tpu.memory_space<vmem>>
      %166 = tpu.memref_slice %arg5[%104] : memref<2x!tpu.dma_semaphore, #tpu.memory_space<semaphore_mem>> -> memref<1x!tpu.dma_semaphore, #tpu.memory_space<semaphore_mem>>
      %167 = tpu.memref_squeeze %166 : memref<1x!tpu.dma_semaphore, #tpu.memory_space<semaphore_mem>> -> memref<!tpu.dma_semaphore, #tpu.memory_space<semaphore_mem>>
      tpu.enqueue_dma source(%163 : memref<1x128xf32, #tpu.memory_space<any>>) target(%165 : memref<1x128xf32, #tpu.memory_space<vmem>>) target_semaphore(%167 : memref<!tpu.dma_semaphore, #tpu.memory_space<semaphore_mem>>)
      %c16_i32_98 = arith.constant 16 : i32
      %168 = arith.muli %103, %c16_i32_98 : i32
      %c7_i32_99 = arith.constant 7 : i32
      %169 = arith.addi %168, %c7_i32_99 : i32
      %170 = arith.index_cast %169 : i32 to index
      %171 = memref.load %arg1[%170] : memref<16xi32, #tpu.memory_space<smem>>
      %c0_i32_100 = arith.constant 0 : i32
      %172 = tpu.memref_slice %arg2[%171, %c0_i32_100] : memref<32x128xf32, #tpu.memory_space<any>> -> memref<1x128xf32, #tpu.memory_space<any>>
      %c7_i32_101 = arith.constant 7 : i32
      %c0_i32_102 = arith.constant 0 : i32
      %173 = tpu.memref_slice %arg4[%104, %c7_i32_101, %c0_i32_102] : memref<2x16x128xf32, #tpu.memory_space<vmem>> -> memref<1x1x128xf32, #tpu.memory_space<vmem>>
      %174 = tpu.memref_squeeze %173 : memref<1x1x128xf32, #tpu.memory_space<vmem>> -> memref<1x128xf32, #tpu.memory_space<vmem>>
      %175 = tpu.memref_slice %arg5[%104] : memref<2x!tpu.dma_semaphore, #tpu.memory_space<semaphore_mem>> -> memref<1x!tpu.dma_semaphore, #tpu.memory_space<semaphore_mem>>
      %176 = tpu.memref_squeeze %175 : memref<1x!tpu.dma_semaphore, #tpu.memory_space<semaphore_mem>> -> memref<!tpu.dma_semaphore, #tpu.memory_space<semaphore_mem>>
      tpu.enqueue_dma source(%172 : memref<1x128xf32, #tpu.memory_space<any>>) target(%174 : memref<1x128xf32, #tpu.memory_space<vmem>>) target_semaphore(%176 : memref<!tpu.dma_semaphore, #tpu.memory_space<semaphore_mem>>)
      %c16_i32_103 = arith.constant 16 : i32
      %177 = arith.muli %103, %c16_i32_103 : i32
      %c8_i32_104 = arith.constant 8 : i32
      %178 = arith.addi %177, %c8_i32_104 : i32
      %179 = arith.index_cast %178 : i32 to index
      %180 = memref.load %arg1[%179] : memref<16xi32, #tpu.memory_space<smem>>
      %c0_i32_105 = arith.constant 0 : i32
      %181 = tpu.memref_slice %arg2[%180, %c0_i32_105] : memref<32x128xf32, #tpu.memory_space<any>> -> memref<1x128xf32, #tpu.memory_space<any>>
      %c8_i32_106 = arith.constant 8 : i32
      %c0_i32_107 = arith.constant 0 : i32
      %182 = tpu.memref_slice %arg4[%104, %c8_i32_106, %c0_i32_107] : memref<2x16x128xf32, #tpu.memory_space<vmem>> -> memref<1x1x128xf32, #tpu.memory_space<vmem>>
      %183 = tpu.memref_squeeze %182 : memref<1x1x128xf32, #tpu.memory_space<vmem>> -> memref<1x128xf32, #tpu.memory_space<vmem>>
      %184 = tpu.memref_slice %arg5[%104] : memref<2x!tpu.dma_semaphore, #tpu.memory_space<semaphore_mem>> -> memref<1x!tpu.dma_semaphore, #tpu.memory_space<semaphore_mem>>
      %185 = tpu.memref_squeeze %184 : memref<1x!tpu.dma_semaphore, #tpu.memory_space<semaphore_mem>> -> memref<!tpu.dma_semaphore, #tpu.memory_space<semaphore_mem>>
      tpu.enqueue_dma source(%181 : memref<1x128xf32, #tpu.memory_space<any>>) target(%183 : memref<1x128xf32, #tpu.memory_space<vmem>>) target_semaphore(%185 : memref<!tpu.dma_semaphore, #tpu.memory_space<semaphore_mem>>)
      %c16_i32_108 = arith.constant 16 : i32
      %186 = arith.muli %103, %c16_i32_108 : i32
      %c9_i32_109 = arith.constant 9 : i32
      %187 = arith.addi %186, %c9_i32_109 : i32
      %188 = arith.index_cast %187 : i32 to index
      %189 = memref.load %arg1[%188] : memref<16xi32, #tpu.memory_space<smem>>
      %c0_i32_110 = arith.constant 0 : i32
      %190 = tpu.memref_slice %arg2[%189, %c0_i32_110] : memref<32x128xf32, #tpu.memory_space<any>> -> memref<1x128xf32, #tpu.memory_space<any>>
      %c9_i32_111 = arith.constant 9 : i32
      %c0_i32_112 = arith.constant 0 : i32
      %191 = tpu.memref_slice %arg4[%104, %c9_i32_111, %c0_i32_112] : memref<2x16x128xf32, #tpu.memory_space<vmem>> -> memref<1x1x128xf32, #tpu.memory_space<vmem>>
      %192 = tpu.memref_squeeze %191 : memref<1x1x128xf32, #tpu.memory_space<vmem>> -> memref<1x128xf32, #tpu.memory_space<vmem>>
      %193 = tpu.memref_slice %arg5[%104] : memref<2x!tpu.dma_semaphore, #tpu.memory_space<semaphore_mem>> -> memref<1x!tpu.dma_semaphore, #tpu.memory_space<semaphore_mem>>
      %194 = tpu.memref_squeeze %193 : memref<1x!tpu.dma_semaphore, #tpu.memory_space<semaphore_mem>> -> memref<!tpu.dma_semaphore, #tpu.memory_space<semaphore_mem>>
      tpu.enqueue_dma source(%190 : memref<1x128xf32, #tpu.memory_space<any>>) target(%192 : memref<1x128xf32, #tpu.memory_space<vmem>>) target_semaphore(%194 : memref<!tpu.dma_semaphore, #tpu.memory_space<semaphore_mem>>)
      %c16_i32_113 = arith.constant 16 : i32
      %195 = arith.muli %103, %c16_i32_113 : i32
      %c10_i32_114 = arith.constant 10 : i32
      %196 = arith.addi %195, %c10_i32_114 : i32
      %197 = arith.index_cast %196 : i32 to index
      %198 = memref.load %arg1[%197] : memref<16xi32, #tpu.memory_space<smem>>
      %c0_i32_115 = arith.constant 0 : i32
      %199 = tpu.memref_slice %arg2[%198, %c0_i32_115] : memref<32x128xf32, #tpu.memory_space<any>> -> memref<1x128xf32, #tpu.memory_space<any>>
      %c10_i32_116 = arith.constant 10 : i32
      %c0_i32_117 = arith.constant 0 : i32
      %200 = tpu.memref_slice %arg4[%104, %c10_i32_116, %c0_i32_117] : memref<2x16x128xf32, #tpu.memory_space<vmem>> -> memref<1x1x128xf32, #tpu.memory_space<vmem>>
      %201 = tpu.memref_squeeze %200 : memref<1x1x128xf32, #tpu.memory_space<vmem>> -> memref<1x128xf32, #tpu.memory_space<vmem>>
      %202 = tpu.memref_slice %arg5[%104] : memref<2x!tpu.dma_semaphore, #tpu.memory_space<semaphore_mem>> -> memref<1x!tpu.dma_semaphore, #tpu.memory_space<semaphore_mem>>
      %203 = tpu.memref_squeeze %202 : memref<1x!tpu.dma_semaphore, #tpu.memory_space<semaphore_mem>> -> memref<!tpu.dma_semaphore, #tpu.memory_space<semaphore_mem>>
      tpu.enqueue_dma source(%199 : memref<1x128xf32, #tpu.memory_space<any>>) target(%201 : memref<1x128xf32, #tpu.memory_space<vmem>>) target_semaphore(%203 : memref<!tpu.dma_semaphore, #tpu.memory_space<semaphore_mem>>)
      %c16_i32_118 = arith.constant 16 : i32
      %204 = arith.muli %103, %c16_i32_118 : i32
      %c11_i32_119 = arith.constant 11 : i32
      %205 = arith.addi %204, %c11_i32_119 : i32
      %206 = arith.index_cast %205 : i32 to index
      %207 = memref.load %arg1[%206] : memref<16xi32, #tpu.memory_space<smem>>
      %c0_i32_120 = arith.constant 0 : i32
      %208 = tpu.memref_slice %arg2[%207, %c0_i32_120] : memref<32x128xf32, #tpu.memory_space<any>> -> memref<1x128xf32, #tpu.memory_space<any>>
      %c11_i32_121 = arith.constant 11 : i32
      %c0_i32_122 = arith.constant 0 : i32
      %209 = tpu.memref_slice %arg4[%104, %c11_i32_121, %c0_i32_122] : memref<2x16x128xf32, #tpu.memory_space<vmem>> -> memref<1x1x128xf32, #tpu.memory_space<vmem>>
      %210 = tpu.memref_squeeze %209 : memref<1x1x128xf32, #tpu.memory_space<vmem>> -> memref<1x128xf32, #tpu.memory_space<vmem>>
      %211 = tpu.memref_slice %arg5[%104] : memref<2x!tpu.dma_semaphore, #tpu.memory_space<semaphore_mem>> -> memref<1x!tpu.dma_semaphore, #tpu.memory_space<semaphore_mem>>
      %212 = tpu.memref_squeeze %211 : memref<1x!tpu.dma_semaphore, #tpu.memory_space<semaphore_mem>> -> memref<!tpu.dma_semaphore, #tpu.memory_space<semaphore_mem>>
      tpu.enqueue_dma source(%208 : memref<1x128xf32, #tpu.memory_space<any>>) target(%210 : memref<1x128xf32, #tpu.memory_space<vmem>>) target_semaphore(%212 : memref<!tpu.dma_semaphore, #tpu.memory_space<semaphore_mem>>)
      %c16_i32_123 = arith.constant 16 : i32
      %213 = arith.muli %103, %c16_i32_123 : i32
      %c12_i32_124 = arith.constant 12 : i32
      %214 = arith.addi %213, %c12_i32_124 : i32
      %215 = arith.index_cast %214 : i32 to index
      %216 = memref.load %arg1[%215] : memref<16xi32, #tpu.memory_space<smem>>
      %c0_i32_125 = arith.constant 0 : i32
      %217 = tpu.memref_slice %arg2[%216, %c0_i32_125] : memref<32x128xf32, #tpu.memory_space<any>> -> memref<1x128xf32, #tpu.memory_space<any>>
      %c12_i32_126 = arith.constant 12 : i32
      %c0_i32_127 = arith.constant 0 : i32
      %218 = tpu.memref_slice %arg4[%104, %c12_i32_126, %c0_i32_127] : memref<2x16x128xf32, #tpu.memory_space<vmem>> -> memref<1x1x128xf32, #tpu.memory_space<vmem>>
      %219 = tpu.memref_squeeze %218 : memref<1x1x128xf32, #tpu.memory_space<vmem>> -> memref<1x128xf32, #tpu.memory_space<vmem>>
      %220 = tpu.memref_slice %arg5[%104] : memref<2x!tpu.dma_semaphore, #tpu.memory_space<semaphore_mem>> -> memref<1x!tpu.dma_semaphore, #tpu.memory_space<semaphore_mem>>
      %221 = tpu.memref_squeeze %220 : memref<1x!tpu.dma_semaphore, #tpu.memory_space<semaphore_mem>> -> memref<!tpu.dma_semaphore, #tpu.memory_space<semaphore_mem>>
      tpu.enqueue_dma source(%217 : memref<1x128xf32, #tpu.memory_space<any>>) target(%219 : memref<1x128xf32, #tpu.memory_space<vmem>>) target_semaphore(%221 : memref<!tpu.dma_semaphore, #tpu.memory_space<semaphore_mem>>)
      %c16_i32_128 = arith.constant 16 : i32
      %222 = arith.muli %103, %c16_i32_128 : i32
      %c13_i32_129 = arith.constant 13 : i32
      %223 = arith.addi %222, %c13_i32_129 : i32
      %224 = arith.index_cast %223 : i32 to index
      %225 = memref.load %arg1[%224] : memref<16xi32, #tpu.memory_space<smem>>
      %c0_i32_130 = arith.constant 0 : i32
      %226 = tpu.memref_slice %arg2[%225, %c0_i32_130] : memref<32x128xf32, #tpu.memory_space<any>> -> memref<1x128xf32, #tpu.memory_space<any>>
      %c13_i32_131 = arith.constant 13 : i32
      %c0_i32_132 = arith.constant 0 : i32
      %227 = tpu.memref_slice %arg4[%104, %c13_i32_131, %c0_i32_132] : memref<2x16x128xf32, #tpu.memory_space<vmem>> -> memref<1x1x128xf32, #tpu.memory_space<vmem>>
      %228 = tpu.memref_squeeze %227 : memref<1x1x128xf32, #tpu.memory_space<vmem>> -> memref<1x128xf32, #tpu.memory_space<vmem>>
      %229 = tpu.memref_slice %arg5[%104] : memref<2x!tpu.dma_semaphore, #tpu.memory_space<semaphore_mem>> -> memref<1x!tpu.dma_semaphore, #tpu.memory_space<semaphore_mem>>
      %230 = tpu.memref_squeeze %229 : memref<1x!tpu.dma_semaphore, #tpu.memory_space<semaphore_mem>> -> memref<!tpu.dma_semaphore, #tpu.memory_space<semaphore_mem>>
      tpu.enqueue_dma source(%226 : memref<1x128xf32, #tpu.memory_space<any>>) target(%228 : memref<1x128xf32, #tpu.memory_space<vmem>>) target_semaphore(%230 : memref<!tpu.dma_semaphore, #tpu.memory_space<semaphore_mem>>)
      %c16_i32_133 = arith.constant 16 : i32
      %231 = arith.muli %103, %c16_i32_133 : i32
      %c14_i32_134 = arith.constant 14 : i32
      %232 = arith.addi %231, %c14_i32_134 : i32
      %233 = arith.index_cast %232 : i32 to index
      %234 = memref.load %arg1[%233] : memref<16xi32, #tpu.memory_space<smem>>
      %c0_i32_135 = arith.constant 0 : i32
      %235 = tpu.memref_slice %arg2[%234, %c0_i32_135] : memref<32x128xf32, #tpu.memory_space<any>> -> memref<1x128xf32, #tpu.memory_space<any>>
      %c14_i32_136 = arith.constant 14 : i32
      %c0_i32_137 = arith.constant 0 : i32
      %236 = tpu.memref_slice %arg4[%104, %c14_i32_136, %c0_i32_137] : memref<2x16x128xf32, #tpu.memory_space<vmem>> -> memref<1x1x128xf32, #tpu.memory_space<vmem>>
      %237 = tpu.memref_squeeze %236 : memref<1x1x128xf32, #tpu.memory_space<vmem>> -> memref<1x128xf32, #tpu.memory_space<vmem>>
      %238 = tpu.memref_slice %arg5[%104] : memref<2x!tpu.dma_semaphore, #tpu.memory_space<semaphore_mem>> -> memref<1x!tpu.dma_semaphore, #tpu.memory_space<semaphore_mem>>
      %239 = tpu.memref_squeeze %238 : memref<1x!tpu.dma_semaphore, #tpu.memory_space<semaphore_mem>> -> memref<!tpu.dma_semaphore, #tpu.memory_space<semaphore_mem>>
      tpu.enqueue_dma source(%235 : memref<1x128xf32, #tpu.memory_space<any>>) target(%237 : memref<1x128xf32, #tpu.memory_space<vmem>>) target_semaphore(%239 : memref<!tpu.dma_semaphore, #tpu.memory_space<semaphore_mem>>)
      %c16_i32_138 = arith.constant 16 : i32
      %240 = arith.muli %103, %c16_i32_138 : i32
      %c15_i32_139 = arith.constant 15 : i32
      %241 = arith.addi %240, %c15_i32_139 : i32
      %242 = arith.index_cast %241 : i32 to index
      %243 = memref.load %arg1[%242] : memref<16xi32, #tpu.memory_space<smem>>
      %c0_i32_140 = arith.constant 0 : i32
      %244 = tpu.memref_slice %arg2[%243, %c0_i32_140] : memref<32x128xf32, #tpu.memory_space<any>> -> memref<1x128xf32, #tpu.memory_space<any>>
      %c15_i32_141 = arith.constant 15 : i32
      %c0_i32_142 = arith.constant 0 : i32
      %245 = tpu.memref_slice %arg4[%104, %c15_i32_141, %c0_i32_142] : memref<2x16x128xf32, #tpu.memory_space<vmem>> -> memref<1x1x128xf32, #tpu.memory_space<vmem>>
      %246 = tpu.memref_squeeze %245 : memref<1x1x128xf32, #tpu.memory_space<vmem>> -> memref<1x128xf32, #tpu.memory_space<vmem>>
      %247 = tpu.memref_slice %arg5[%104] : memref<2x!tpu.dma_semaphore, #tpu.memory_space<semaphore_mem>> -> memref<1x!tpu.dma_semaphore, #tpu.memory_space<semaphore_mem>>
      %248 = tpu.memref_squeeze %247 : memref<1x!tpu.dma_semaphore, #tpu.memory_space<semaphore_mem>> -> memref<!tpu.dma_semaphore, #tpu.memory_space<semaphore_mem>>
      tpu.enqueue_dma source(%244 : memref<1x128xf32, #tpu.memory_space<any>>) target(%246 : memref<1x128xf32, #tpu.memory_space<vmem>>) target_semaphore(%248 : memref<!tpu.dma_semaphore, #tpu.memory_space<semaphore_mem>>)
    } else {
    }
    %c0_i32_8 = arith.constant 0 : i32
    %c0_i32_9 = arith.constant 0 : i32
    %17 = tpu.memref_slice %arg2[%c0_i32_8, %c0_i32_9] : memref<32x128xf32, #tpu.memory_space<any>> -> memref<1x128xf32, #tpu.memory_space<any>>
    %c0_i32_10 = arith.constant 0 : i32
    %c0_i32_11 = arith.constant 0 : i32
    %18 = tpu.memref_slice %arg4[%9, %c0_i32_10, %c0_i32_11] : memref<2x16x128xf32, #tpu.memory_space<vmem>> -> memref<1x1x128xf32, #tpu.memory_space<vmem>>
    %19 = tpu.memref_squeeze %18 : memref<1x1x128xf32, #tpu.memory_space<vmem>> -> memref<1x128xf32, #tpu.memory_space<vmem>>
    %20 = tpu.memref_slice %arg5[%9] : memref<2x!tpu.dma_semaphore, #tpu.memory_space<semaphore_mem>> -> memref<1x!tpu.dma_semaphore, #tpu.memory_space<semaphore_mem>>
    %21 = tpu.memref_squeeze %20 : memref<1x!tpu.dma_semaphore, #tpu.memory_space<semaphore_mem>> -> memref<!tpu.dma_semaphore, #tpu.memory_space<semaphore_mem>>
    tpu.wait_dma2 semaphore(%21 : memref<!tpu.dma_semaphore, #tpu.memory_space<semaphore_mem>>) src(%17 : memref<1x128xf32, #tpu.memory_space<any>>) dst(%19 : memref<1x128xf32, #tpu.memory_space<vmem>>)
    %c0_i32_12 = arith.constant 0 : i32
    %c0_i32_13 = arith.constant 0 : i32
    %22 = tpu.memref_slice %arg2[%c0_i32_12, %c0_i32_13] : memref<32x128xf32, #tpu.memory_space<any>> -> memref<1x128xf32, #tpu.memory_space<any>>
    %c1_i32_14 = arith.constant 1 : i32
    %c0_i32_15 = arith.constant 0 : i32
    %23 = tpu.memref_slice %arg4[%9, %c1_i32_14, %c0_i32_15] : memref<2x16x128xf32, #tpu.memory_space<vmem>> -> memref<1x1x128xf32, #tpu.memory_space<vmem>>
    %24 = tpu.memref_squeeze %23 : memref<1x1x128xf32, #tpu.memory_space<vmem>> -> memref<1x128xf32, #tpu.memory_space<vmem>>
    %25 = tpu.memref_slice %arg5[%9] : memref<2x!tpu.dma_semaphore, #tpu.memory_space<semaphore_mem>> -> memref<1x!tpu.dma_semaphore, #tpu.memory_space<semaphore_mem>>
    %26 = tpu.memref_squeeze %25 : memref<1x!tpu.dma_semaphore, #tpu.memory_space<semaphore_mem>> -> memref<!tpu.dma_semaphore, #tpu.memory_space<semaphore_mem>>
    tpu.wait_dma2 semaphore(%26 : memref<!tpu.dma_semaphore, #tpu.memory_space<semaphore_mem>>) src(%22 : memref<1x128xf32, #tpu.memory_space<any>>) dst(%24 : memref<1x128xf32, #tpu.memory_space<vmem>>)
    %c0_i32_16 = arith.constant 0 : i32
    %c0_i32_17 = arith.constant 0 : i32
    %27 = tpu.memref_slice %arg2[%c0_i32_16, %c0_i32_17] : memref<32x128xf32, #tpu.memory_space<any>> -> memref<1x128xf32, #tpu.memory_space<any>>
    %c2_i32_18 = arith.constant 2 : i32
    %c0_i32_19 = arith.constant 0 : i32
    %28 = tpu.memref_slice %arg4[%9, %c2_i32_18, %c0_i32_19] : memref<2x16x128xf32, #tpu.memory_space<vmem>> -> memref<1x1x128xf32, #tpu.memory_space<vmem>>
    %29 = tpu.memref_squeeze %28 : memref<1x1x128xf32, #tpu.memory_space<vmem>> -> memref<1x128xf32, #tpu.memory_space<vmem>>
    %30 = tpu.memref_slice %arg5[%9] : memref<2x!tpu.dma_semaphore, #tpu.memory_space<semaphore_mem>> -> memref<1x!tpu.dma_semaphore, #tpu.memory_space<semaphore_mem>>
    %31 = tpu.memref_squeeze %30 : memref<1x!tpu.dma_semaphore, #tpu.memory_space<semaphore_mem>> -> memref<!tpu.dma_semaphore, #tpu.memory_space<semaphore_mem>>
    tpu.wait_dma2 semaphore(%31 : memref<!tpu.dma_semaphore, #tpu.memory_space<semaphore_mem>>) src(%27 : memref<1x128xf32, #tpu.memory_space<any>>) dst(%29 : memref<1x128xf32, #tpu.memory_space<vmem>>)
    %c0_i32_20 = arith.constant 0 : i32
    %c0_i32_21 = arith.constant 0 : i32
    %32 = tpu.memref_slice %arg2[%c0_i32_20, %c0_i32_21] : memref<32x128xf32, #tpu.memory_space<any>> -> memref<1x128xf32, #tpu.memory_space<any>>
    %c3_i32 = arith.constant 3 : i32
    %c0_i32_22 = arith.constant 0 : i32
    %33 = tpu.memref_slice %arg4[%9, %c3_i32, %c0_i32_22] : memref<2x16x128xf32, #tpu.memory_space<vmem>> -> memref<1x1x128xf32, #tpu.memory_space<vmem>>
    %34 = tpu.memref_squeeze %33 : memref<1x1x128xf32, #tpu.memory_space<vmem>> -> memref<1x128xf32, #tpu.memory_space<vmem>>
    %35 = tpu.memref_slice %arg5[%9] : memref<2x!tpu.dma_semaphore, #tpu.memory_space<semaphore_mem>> -> memref<1x!tpu.dma_semaphore, #tpu.memory_space<semaphore_mem>>
    %36 = tpu.memref_squeeze %35 : memref<1x!tpu.dma_semaphore, #tpu.memory_space<semaphore_mem>> -> memref<!tpu.dma_semaphore, #tpu.memory_space<semaphore_mem>>
    tpu.wait_dma2 semaphore(%36 : memref<!tpu.dma_semaphore, #tpu.memory_space<semaphore_mem>>) src(%32 : memref<1x128xf32, #tpu.memory_space<any>>) dst(%34 : memref<1x128xf32, #tpu.memory_space<vmem>>)
    %c0_i32_23 = arith.constant 0 : i32
    %c0_i32_24 = arith.constant 0 : i32
    %37 = tpu.memref_slice %arg2[%c0_i32_23, %c0_i32_24] : memref<32x128xf32, #tpu.memory_space<any>> -> memref<1x128xf32, #tpu.memory_space<any>>
    %c4_i32 = arith.constant 4 : i32
    %c0_i32_25 = arith.constant 0 : i32
    %38 = tpu.memref_slice %arg4[%9, %c4_i32, %c0_i32_25] : memref<2x16x128xf32, #tpu.memory_space<vmem>> -> memref<1x1x128xf32, #tpu.memory_space<vmem>>
    %39 = tpu.memref_squeeze %38 : memref<1x1x128xf32, #tpu.memory_space<vmem>> -> memref<1x128xf32, #tpu.memory_space<vmem>>
    %40 = tpu.memref_slice %arg5[%9] : memref<2x!tpu.dma_semaphore, #tpu.memory_space<semaphore_mem>> -> memref<1x!tpu.dma_semaphore, #tpu.memory_space<semaphore_mem>>
    %41 = tpu.memref_squeeze %40 : memref<1x!tpu.dma_semaphore, #tpu.memory_space<semaphore_mem>> -> memref<!tpu.dma_semaphore, #tpu.memory_space<semaphore_mem>>
    tpu.wait_dma2 semaphore(%41 : memref<!tpu.dma_semaphore, #tpu.memory_space<semaphore_mem>>) src(%37 : memref<1x128xf32, #tpu.memory_space<any>>) dst(%39 : memref<1x128xf32, #tpu.memory_space<vmem>>)
    %c0_i32_26 = arith.constant 0 : i32
    %c0_i32_27 = arith.constant 0 : i32
    %42 = tpu.memref_slice %arg2[%c0_i32_26, %c0_i32_27] : memref<32x128xf32, #tpu.memory_space<any>> -> memref<1x128xf32, #tpu.memory_space<any>>
    %c5_i32 = arith.constant 5 : i32
    %c0_i32_28 = arith.constant 0 : i32
    %43 = tpu.memref_slice %arg4[%9, %c5_i32, %c0_i32_28] : memref<2x16x128xf32, #tpu.memory_space<vmem>> -> memref<1x1x128xf32, #tpu.memory_space<vmem>>
    %44 = tpu.memref_squeeze %43 : memref<1x1x128xf32, #tpu.memory_space<vmem>> -> memref<1x128xf32, #tpu.memory_space<vmem>>
    %45 = tpu.memref_slice %arg5[%9] : memref<2x!tpu.dma_semaphore, #tpu.memory_space<semaphore_mem>> -> memref<1x!tpu.dma_semaphore, #tpu.memory_space<semaphore_mem>>
    %46 = tpu.memref_squeeze %45 : memref<1x!tpu.dma_semaphore, #tpu.memory_space<semaphore_mem>> -> memref<!tpu.dma_semaphore, #tpu.memory_space<semaphore_mem>>
    tpu.wait_dma2 semaphore(%46 : memref<!tpu.dma_semaphore, #tpu.memory_space<semaphore_mem>>) src(%42 : memref<1x128xf32, #tpu.memory_space<any>>) dst(%44 : memref<1x128xf32, #tpu.memory_space<vmem>>)
    %c0_i32_29 = arith.constant 0 : i32
    %c0_i32_30 = arith.constant 0 : i32
    %47 = tpu.memref_slice %arg2[%c0_i32_29, %c0_i32_30] : memref<32x128xf32, #tpu.memory_space<any>> -> memref<1x128xf32, #tpu.memory_space<any>>
    %c6_i32 = arith.constant 6 : i32
    %c0_i32_31 = arith.constant 0 : i32
    %48 = tpu.memref_slice %arg4[%9, %c6_i32, %c0_i32_31] : memref<2x16x128xf32, #tpu.memory_space<vmem>> -> memref<1x1x128xf32, #tpu.memory_space<vmem>>
    %49 = tpu.memref_squeeze %48 : memref<1x1x128xf32, #tpu.memory_space<vmem>> -> memref<1x128xf32, #tpu.memory_space<vmem>>
    %50 = tpu.memref_slice %arg5[%9] : memref<2x!tpu.dma_semaphore, #tpu.memory_space<semaphore_mem>> -> memref<1x!tpu.dma_semaphore, #tpu.memory_space<semaphore_mem>>
    %51 = tpu.memref_squeeze %50 : memref<1x!tpu.dma_semaphore, #tpu.memory_space<semaphore_mem>> -> memref<!tpu.dma_semaphore, #tpu.memory_space<semaphore_mem>>
    tpu.wait_dma2 semaphore(%51 : memref<!tpu.dma_semaphore, #tpu.memory_space<semaphore_mem>>) src(%47 : memref<1x128xf32, #tpu.memory_space<any>>) dst(%49 : memref<1x128xf32, #tpu.memory_space<vmem>>)
    %c0_i32_32 = arith.constant 0 : i32
    %c0_i32_33 = arith.constant 0 : i32
    %52 = tpu.memref_slice %arg2[%c0_i32_32, %c0_i32_33] : memref<32x128xf32, #tpu.memory_space<any>> -> memref<1x128xf32, #tpu.memory_space<any>>
    %c7_i32 = arith.constant 7 : i32
    %c0_i32_34 = arith.constant 0 : i32
    %53 = tpu.memref_slice %arg4[%9, %c7_i32, %c0_i32_34] : memref<2x16x128xf32, #tpu.memory_space<vmem>> -> memref<1x1x128xf32, #tpu.memory_space<vmem>>
    %54 = tpu.memref_squeeze %53 : memref<1x1x128xf32, #tpu.memory_space<vmem>> -> memref<1x128xf32, #tpu.memory_space<vmem>>
    %55 = tpu.memref_slice %arg5[%9] : memref<2x!tpu.dma_semaphore, #tpu.memory_space<semaphore_mem>> -> memref<1x!tpu.dma_semaphore, #tpu.memory_space<semaphore_mem>>
    %56 = tpu.memref_squeeze %55 : memref<1x!tpu.dma_semaphore, #tpu.memory_space<semaphore_mem>> -> memref<!tpu.dma_semaphore, #tpu.memory_space<semaphore_mem>>
    tpu.wait_dma2 semaphore(%56 : memref<!tpu.dma_semaphore, #tpu.memory_space<semaphore_mem>>) src(%52 : memref<1x128xf32, #tpu.memory_space<any>>) dst(%54 : memref<1x128xf32, #tpu.memory_space<vmem>>)
    %c0_i32_35 = arith.constant 0 : i32
    %c0_i32_36 = arith.constant 0 : i32
    %57 = tpu.memref_slice %arg2[%c0_i32_35, %c0_i32_36] : memref<32x128xf32, #tpu.memory_space<any>> -> memref<1x128xf32, #tpu.memory_space<any>>
    %c8_i32 = arith.constant 8 : i32
    %c0_i32_37 = arith.constant 0 : i32
    %58 = tpu.memref_slice %arg4[%9, %c8_i32, %c0_i32_37] : memref<2x16x128xf32, #tpu.memory_space<vmem>> -> memref<1x1x128xf32, #tpu.memory_space<vmem>>
    %59 = tpu.memref_squeeze %58 : memref<1x1x128xf32, #tpu.memory_space<vmem>> -> memref<1x128xf32, #tpu.memory_space<vmem>>
    %60 = tpu.memref_slice %arg5[%9] : memref<2x!tpu.dma_semaphore, #tpu.memory_space<semaphore_mem>> -> memref<1x!tpu.dma_semaphore, #tpu.memory_space<semaphore_mem>>
    %61 = tpu.memref_squeeze %60 : memref<1x!tpu.dma_semaphore, #tpu.memory_space<semaphore_mem>> -> memref<!tpu.dma_semaphore, #tpu.memory_space<semaphore_mem>>
    tpu.wait_dma2 semaphore(%61 : memref<!tpu.dma_semaphore, #tpu.memory_space<semaphore_mem>>) src(%57 : memref<1x128xf32, #tpu.memory_space<any>>) dst(%59 : memref<1x128xf32, #tpu.memory_space<vmem>>)
    %c0_i32_38 = arith.constant 0 : i32
    %c0_i32_39 = arith.constant 0 : i32
    %62 = tpu.memref_slice %arg2[%c0_i32_38, %c0_i32_39] : memref<32x128xf32, #tpu.memory_space<any>> -> memref<1x128xf32, #tpu.memory_space<any>>
    %c9_i32 = arith.constant 9 : i32
    %c0_i32_40 = arith.constant 0 : i32
    %63 = tpu.memref_slice %arg4[%9, %c9_i32, %c0_i32_40] : memref<2x16x128xf32, #tpu.memory_space<vmem>> -> memref<1x1x128xf32, #tpu.memory_space<vmem>>
    %64 = tpu.memref_squeeze %63 : memref<1x1x128xf32, #tpu.memory_space<vmem>> -> memref<1x128xf32, #tpu.memory_space<vmem>>
    %65 = tpu.memref_slice %arg5[%9] : memref<2x!tpu.dma_semaphore, #tpu.memory_space<semaphore_mem>> -> memref<1x!tpu.dma_semaphore, #tpu.memory_space<semaphore_mem>>
    %66 = tpu.memref_squeeze %65 : memref<1x!tpu.dma_semaphore, #tpu.memory_space<semaphore_mem>> -> memref<!tpu.dma_semaphore, #tpu.memory_space<semaphore_mem>>
    tpu.wait_dma2 semaphore(%66 : memref<!tpu.dma_semaphore, #tpu.memory_space<semaphore_mem>>) src(%62 : memref<1x128xf32, #tpu.memory_space<any>>) dst(%64 : memref<1x128xf32, #tpu.memory_space<vmem>>)
    %c0_i32_41 = arith.constant 0 : i32
    %c0_i32_42 = arith.constant 0 : i32
    %67 = tpu.memref_slice %arg2[%c0_i32_41, %c0_i32_42] : memref<32x128xf32, #tpu.memory_space<any>> -> memref<1x128xf32, #tpu.memory_space<any>>
    %c10_i32 = arith.constant 10 : i32
    %c0_i32_43 = arith.constant 0 : i32
    %68 = tpu.memref_slice %arg4[%9, %c10_i32, %c0_i32_43] : memref<2x16x128xf32, #tpu.memory_space<vmem>> -> memref<1x1x128xf32, #tpu.memory_space<vmem>>
    %69 = tpu.memref_squeeze %68 : memref<1x1x128xf32, #tpu.memory_space<vmem>> -> memref<1x128xf32, #tpu.memory_space<vmem>>
    %70 = tpu.memref_slice %arg5[%9] : memref<2x!tpu.dma_semaphore, #tpu.memory_space<semaphore_mem>> -> memref<1x!tpu.dma_semaphore, #tpu.memory_space<semaphore_mem>>
    %71 = tpu.memref_squeeze %70 : memref<1x!tpu.dma_semaphore, #tpu.memory_space<semaphore_mem>> -> memref<!tpu.dma_semaphore, #tpu.memory_space<semaphore_mem>>
    tpu.wait_dma2 semaphore(%71 : memref<!tpu.dma_semaphore, #tpu.memory_space<semaphore_mem>>) src(%67 : memref<1x128xf32, #tpu.memory_space<any>>) dst(%69 : memref<1x128xf32, #tpu.memory_space<vmem>>)
    %c0_i32_44 = arith.constant 0 : i32
    %c0_i32_45 = arith.constant 0 : i32
    %72 = tpu.memref_slice %arg2[%c0_i32_44, %c0_i32_45] : memref<32x128xf32, #tpu.memory_space<any>> -> memref<1x128xf32, #tpu.memory_space<any>>
    %c11_i32 = arith.constant 11 : i32
    %c0_i32_46 = arith.constant 0 : i32
    %73 = tpu.memref_slice %arg4[%9, %c11_i32, %c0_i32_46] : memref<2x16x128xf32, #tpu.memory_space<vmem>> -> memref<1x1x128xf32, #tpu.memory_space<vmem>>
    %74 = tpu.memref_squeeze %73 : memref<1x1x128xf32, #tpu.memory_space<vmem>> -> memref<1x128xf32, #tpu.memory_space<vmem>>
    %75 = tpu.memref_slice %arg5[%9] : memref<2x!tpu.dma_semaphore, #tpu.memory_space<semaphore_mem>> -> memref<1x!tpu.dma_semaphore, #tpu.memory_space<semaphore_mem>>
    %76 = tpu.memref_squeeze %75 : memref<1x!tpu.dma_semaphore, #tpu.memory_space<semaphore_mem>> -> memref<!tpu.dma_semaphore, #tpu.memory_space<semaphore_mem>>
    tpu.wait_dma2 semaphore(%76 : memref<!tpu.dma_semaphore, #tpu.memory_space<semaphore_mem>>) src(%72 : memref<1x128xf32, #tpu.memory_space<any>>) dst(%74 : memref<1x128xf32, #tpu.memory_space<vmem>>)
    %c0_i32_47 = arith.constant 0 : i32
    %c0_i32_48 = arith.constant 0 : i32
    %77 = tpu.memref_slice %arg2[%c0_i32_47, %c0_i32_48] : memref<32x128xf32, #tpu.memory_space<any>> -> memref<1x128xf32, #tpu.memory_space<any>>
    %c12_i32 = arith.constant 12 : i32
    %c0_i32_49 = arith.constant 0 : i32
    %78 = tpu.memref_slice %arg4[%9, %c12_i32, %c0_i32_49] : memref<2x16x128xf32, #tpu.memory_space<vmem>> -> memref<1x1x128xf32, #tpu.memory_space<vmem>>
    %79 = tpu.memref_squeeze %78 : memref<1x1x128xf32, #tpu.memory_space<vmem>> -> memref<1x128xf32, #tpu.memory_space<vmem>>
    %80 = tpu.memref_slice %arg5[%9] : memref<2x!tpu.dma_semaphore, #tpu.memory_space<semaphore_mem>> -> memref<1x!tpu.dma_semaphore, #tpu.memory_space<semaphore_mem>>
    %81 = tpu.memref_squeeze %80 : memref<1x!tpu.dma_semaphore, #tpu.memory_space<semaphore_mem>> -> memref<!tpu.dma_semaphore, #tpu.memory_space<semaphore_mem>>
    tpu.wait_dma2 semaphore(%81 : memref<!tpu.dma_semaphore, #tpu.memory_space<semaphore_mem>>) src(%77 : memref<1x128xf32, #tpu.memory_space<any>>) dst(%79 : memref<1x128xf32, #tpu.memory_space<vmem>>)
    %c0_i32_50 = arith.constant 0 : i32
    %c0_i32_51 = arith.constant 0 : i32
    %82 = tpu.memref_slice %arg2[%c0_i32_50, %c0_i32_51] : memref<32x128xf32, #tpu.memory_space<any>> -> memref<1x128xf32, #tpu.memory_space<any>>
    %c13_i32 = arith.constant 13 : i32
    %c0_i32_52 = arith.constant 0 : i32
    %83 = tpu.memref_slice %arg4[%9, %c13_i32, %c0_i32_52] : memref<2x16x128xf32, #tpu.memory_space<vmem>> -> memref<1x1x128xf32, #tpu.memory_space<vmem>>
    %84 = tpu.memref_squeeze %83 : memref<1x1x128xf32, #tpu.memory_space<vmem>> -> memref<1x128xf32, #tpu.memory_space<vmem>>
    %85 = tpu.memref_slice %arg5[%9] : memref<2x!tpu.dma_semaphore, #tpu.memory_space<semaphore_mem>> -> memref<1x!tpu.dma_semaphore, #tpu.memory_space<semaphore_mem>>
    %86 = tpu.memref_squeeze %85 : memref<1x!tpu.dma_semaphore, #tpu.memory_space<semaphore_mem>> -> memref<!tpu.dma_semaphore, #tpu.memory_space<semaphore_mem>>
    tpu.wait_dma2 semaphore(%86 : memref<!tpu.dma_semaphore, #tpu.memory_space<semaphore_mem>>) src(%82 : memref<1x128xf32, #tpu.memory_space<any>>) dst(%84 : memref<1x128xf32, #tpu.memory_space<vmem>>)
    %c0_i32_53 = arith.constant 0 : i32
    %c0_i32_54 = arith.constant 0 : i32
    %87 = tpu.memref_slice %arg2[%c0_i32_53, %c0_i32_54] : memref<32x128xf32, #tpu.memory_space<any>> -> memref<1x128xf32, #tpu.memory_space<any>>
    %c14_i32 = arith.constant 14 : i32
    %c0_i32_55 = arith.constant 0 : i32
    %88 = tpu.memref_slice %arg4[%9, %c14_i32, %c0_i32_55] : memref<2x16x128xf32, #tpu.memory_space<vmem>> -> memref<1x1x128xf32, #tpu.memory_space<vmem>>
    %89 = tpu.memref_squeeze %88 : memref<1x1x128xf32, #tpu.memory_space<vmem>> -> memref<1x128xf32, #tpu.memory_space<vmem>>
    %90 = tpu.memref_slice %arg5[%9] : memref<2x!tpu.dma_semaphore, #tpu.memory_space<semaphore_mem>> -> memref<1x!tpu.dma_semaphore, #tpu.memory_space<semaphore_mem>>
    %91 = tpu.memref_squeeze %90 : memref<1x!tpu.dma_semaphore, #tpu.memory_space<semaphore_mem>> -> memref<!tpu.dma_semaphore, #tpu.memory_space<semaphore_mem>>
    tpu.wait_dma2 semaphore(%91 : memref<!tpu.dma_semaphore, #tpu.memory_space<semaphore_mem>>) src(%87 : memref<1x128xf32, #tpu.memory_space<any>>) dst(%89 : memref<1x128xf32, #tpu.memory_space<vmem>>)
    %c0_i32_56 = arith.constant 0 : i32
    %c0_i32_57 = arith.constant 0 : i32
    %92 = tpu.memref_slice %arg2[%c0_i32_56, %c0_i32_57] : memref<32x128xf32, #tpu.memory_space<any>> -> memref<1x128xf32, #tpu.memory_space<any>>
    %c15_i32 = arith.constant 15 : i32
    %c0_i32_58 = arith.constant 0 : i32
    %93 = tpu.memref_slice %arg4[%9, %c15_i32, %c0_i32_58] : memref<2x16x128xf32, #tpu.memory_space<vmem>> -> memref<1x1x128xf32, #tpu.memory_space<vmem>>
    %94 = tpu.memref_squeeze %93 : memref<1x1x128xf32, #tpu.memory_space<vmem>> -> memref<1x128xf32, #tpu.memory_space<vmem>>
    %95 = tpu.memref_slice %arg5[%9] : memref<2x!tpu.dma_semaphore, #tpu.memory_space<semaphore_mem>> -> memref<1x!tpu.dma_semaphore, #tpu.memory_space<semaphore_mem>>
    %96 = tpu.memref_squeeze %95 : memref<1x!tpu.dma_semaphore, #tpu.memory_space<semaphore_mem>> -> memref<!tpu.dma_semaphore, #tpu.memory_space<semaphore_mem>>
    tpu.wait_dma2 semaphore(%96 : memref<!tpu.dma_semaphore, #tpu.memory_space<semaphore_mem>>) src(%92 : memref<1x128xf32, #tpu.memory_space<any>>) dst(%94 : memref<1x128xf32, #tpu.memory_space<vmem>>)
    %97 = arith.index_cast %9 : i32 to index
    %c0 = arith.constant 0 : index
    %c0_59 = arith.constant 0 : index
    %98 = vector.load %arg4[%97, %c0, %c0_59] : memref<2x16x128xf32, #tpu.memory_space<vmem>>, vector<1x16x128xf32>
    %99 = vector.shape_cast %98 : vector<1x16x128xf32> to vector<16x128xf32>
    %cst = arith.constant 5.65685415 : f32
    %100 = vector.broadcast %cst : f32 to vector<16x128xf32>
    %101 = arith.mulf %99, %100 : vector<16x128xf32>
    %c0_60 = arith.constant 0 : index
    %c0_61 = arith.constant 0 : index
    %102 = vector.load %arg3[%c0_60, %c0_61] : memref<16x128xf32, #tpu.memory_space<vmem>>, vector<16x128xf32>
    tpu.vector_store %arg3[%c0_60, %c0_61], %101 {strides = array<i32>} : memref<16x128xf32, #tpu.memory_space<vmem>>, vector<16x128xf32>,
    return
  }
  func.func @transform_1(%arg0: i32, %arg1: memref<16xi32, #tpu.memory_space<smem>>) -> (i32, i32) {
    %c0_i32 = arith.constant 0 : i32
    %c0_i32_0 = arith.constant 0 : i32
    return %arg0, %c0_i32 : i32, i32
  }
}

</mosaic_0001>

<bundles_post_ra>
// kernel: tpu_custom_call.1
= control target key start
LH: loop header
LB: loop body
LE: loop exit
PB: predicated region body
PF: predicated region fallthrough
CT: control target
= control target key end

     0   :  { %s1213_s12 = smov [#allocation5]   ;;  %s1425_s0 = inlined_call_operand.hbm [shape: s32[16], index: 0, kind: input, shape index: {}]   ;;  %s1426_s1 = inlined_call_operand.hbm [shape: f32[32,128], index: 1, kind: input, shape index: {}]   ;;  %s1427_s2 = inlined_call_operand.hbm [shape: f32[16,128], index: 2, kind: output, shape index: {}]  }
   0x1   :  { %s8_s11 = sshll.u32 %s1425_s0, 4  ;;  %s9_s11 = int_to_ptr.hbm [resolvable:$true] %s8_s11 }
   0x2   :  { %11 = dma.hbm_to_smem %s9_s11, 16, %s1213_s12, [#allocation4] }
   0x3   :  { %1207 = dma.done.wait [#allocation4], 16 }
   0x4   :  { %1208 = vsyncadd [#allocation4], 4294967280 }
   0x5   :  { %14 = sfence }
   0x6   :  { %15 = vsyncpa [#allocation7], 0  ;;  %s28_s13 = sld [smem:[#allocation5]]  ;;  %s1214_s14 = smov [#allocation2]  }
   0x7   :  { %s39_s15 = sshll.u32 %s1214_s14, 4  ;;  %s734_s16 = sld [smem:[#allocation5 + $0x1]]  ;;  %s40_s15 = int_to_ptr.vmem [resolvable:$true] %s39_s15 }
   0x8   :  { %s1215_s17 = smov [#allocation2 + $0x1]   ;;  %s1253_s19 = sld [smem:[#allocation5 + $0x2]] }
   0x9   :  { %s1251_s18 = sshll.u32 %s1215_s17, 4  ;;  %s1216_s0 = smov [#allocation2 + $0x2]   ;;  %s56_s18 = int_to_ptr.vmem [resolvable:$true] %s1251_s18 }
   0xa   :  { %s1256_s20 = sshll.u32 %s1216_s0, 4  ;;  %s1258_s21 = sld [smem:[#allocation5 + $0x3]]  ;;  %s72_s20 = int_to_ptr.vmem [resolvable:$true] %s1256_s20 }
   0xb   :  { %s1270_s6 = scalar_lea.hbm %s1426_s1, 32 }
   0xc   :  { %s29_s24 = scalar_lea.hbm %s1426_s1, %s28_s13 }
   0xd   :  { %s37_s25 = sshll.u32 %s29_s24, 4  ;;  %s44_s28 = scalar_lea.hbm %s1426_s1, %s734_s16  ;;  %s38_s25 = int_to_ptr.hbm [resolvable:$true] %s37_s25 }
   0xe   :  { %s53_s29 = sshll.u32 %s44_s28, 4  ;;  %s799_s30 = sshra.s32 %s38_s25, 4  ;;  %s800_s30 = int_to_ptr.hbm [resolvable:$true] %s799_s30  ;;  %s54_s29 = int_to_ptr.hbm [resolvable:$true] %s53_s29 }
   0xf   :  { %s801_s3 = scalar_lea.hbm %s800_s30, 1  ;;  %p804_p1 = scmp.lt.s32.totalorder %s800_s30, %s1426_s1 }
  0x10   :  { %p802_p0 = scmp.ne.s32.totalorder %s800_s30, %s801_s3  ;;  %p805_p2 = scmp.lt.s32.totalorder %s1270_s6, %s801_s3 }
  0x12   :  { %p806_p3 = por %p805_p2, %p804_p1 }
  0x14   :  { %p807_p4 = pnand %p806_p3, %p802_p0 }
  0x16   :  { %810 = shalt.err (!%p807_p4)  }
  0x17   :  { %42 = dma.hbm_to_vmem [thread:$0]  %s38_s25, 16, %s40_s15, [#allocation3] }
  0x18   :  { %s60_s11 = scalar_lea.hbm %s1426_s1, %s1253_s19  ;;  %s823_s12 = sshra.s32 %s54_s29, 4  ;;  %s824_s12 = int_to_ptr.hbm [resolvable:$true] %s823_s12 }
  0x19   :  { %s825_s13 = scalar_lea.hbm %s824_s12, 1  ;;  %p828_p6 = scmp.lt.s32.totalorder %s824_s12, %s1426_s1 }
  0x1a   :  { %p826_p5 = scmp.ne.s32.totalorder %s824_s12, %s825_s13  ;;  %p829_p7 = scmp.lt.s32.totalorder %s1270_s6, %s825_s13 }
  0x1c   :  { %p830_p8 = por %p829_p7, %p828_p6 }
  0x1e   :  { %p831_p9 = pnand %p830_p8, %p826_p5 }
  0x20   :  { %834 = shalt.err (!%p831_p9)  }
  0x21   :  { %58 = dma.hbm_to_vmem [thread:$0]  %s54_s29, 16, %s56_s18, [#allocation3] }
  0x22   :  { %s69_s15 = sshll.u32 %s60_s11, 4  ;;  %s76_s0 = scalar_lea.hbm %s1426_s1, %s1258_s21  ;;  %s70_s15 = int_to_ptr.hbm [resolvable:$true] %s69_s15 }
  0x23   :  { %s85_s22 = sshll.u32 %s76_s0, 4  ;;  %s847_s23 = sshra.s32 %s70_s15, 4  ;;  %s848_s23 = int_to_ptr.hbm [resolvable:$true] %s847_s23  ;;  %s86_s22 = int_to_ptr.hbm [resolvable:$true] %s85_s22 }
  0x24   :  { %s849_s24 = scalar_lea.hbm %s848_s23, 1  ;;  %p852_p11 = scmp.lt.s32.totalorder %s848_s23, %s1426_s1 }
  0x25   :  { %p850_p10 = scmp.ne.s32.totalorder %s848_s23, %s849_s24  ;;  %p853_p12 = scmp.lt.s32.totalorder %s1270_s6, %s849_s24 }
  0x27   :  { %p854_p13 = por %p853_p12, %p852_p11 }
  0x29   :  { %p855_p0 = pnand %p854_p13, %p850_p10 }
  0x2b   :  { %858 = shalt.err (!%p855_p0)  }
  0x2c   :  { %74 = dma.hbm_to_vmem [thread:$0]  %s70_s15, 16, %s72_s20, [#allocation3] }
  0x2d   :  { %s1217_s18 = smov [#allocation2 + $0x3]   ;;  %s737_s27 = sld [smem:[#allocation5 + $0x4]] }
  0x2e   :  { %s87_s21 = sshll.u32 %s1217_s18, 4  ;;  %s871_s28 = sshra.s32 %s86_s22, 4  ;;  %s88_s21 = int_to_ptr.vmem [resolvable:$true] %s87_s21  ;;  %s872_s28 = int_to_ptr.hbm [resolvable:$true] %s871_s28 }
  0x2f   :  { %s873_s29 = scalar_lea.hbm %s872_s28, 1  ;;  %p876_p2 = scmp.lt.s32.totalorder %s872_s28, %s1426_s1 }
  0x30   :  { %p874_p1 = scmp.ne.s32.totalorder %s872_s28, %s873_s29  ;;  %p877_p3 = scmp.lt.s32.totalorder %s1270_s6, %s873_s29 }
  0x32   :  { %p878_p4 = por %p877_p3, %p876_p2 }
  0x34   :  { %p879_p5 = pnand %p878_p4, %p874_p1 }
  0x36   :  { %882 = shalt.err (!%p879_p5)  }
  0x37   :  { %90 = dma.hbm_to_vmem [thread:$0]  %s86_s22, 16, %s88_s21, [#allocation3] }
  0x38   :  { %s1218_s4 = smov [#allocation2 + $0x4]   ;;  %s738_s5 = sld [smem:[#allocation5 + $0x5]] }
  0x39   :  { %s103_s20 = sshll.u32 %s1218_s4, 4  ;;  %s1219_s7 = smov [#allocation2 + $0x5]   ;;  %s104_s20 = int_to_ptr.vmem [resolvable:$true] %s103_s20 }
  0x3a   :  { %s1300_s8 = sshll.u32 %s1219_s7, 4  ;;  %s739_s9 = sld [smem:[#allocation5 + $0x6]]  ;;  %s120_s8 = int_to_ptr.vmem [resolvable:$true] %s1300_s8 }
  0x3b   :  { %s92_s12 = scalar_lea.hbm %s1426_s1, %s737_s27  ;;  %s1220_s14 = smov [#allocation2 + $0x6]  }
  0x3c   :  { %s101_s13 = sshll.u32 %s92_s12, 4  ;;  %s1306_s16 = sshll.u32 %s1220_s14, 4  ;;  %s102_s13 = int_to_ptr.hbm [resolvable:$true] %s101_s13  ;;  %s136_s16 = int_to_ptr.vmem [resolvable:$true] %s1306_s16 }
  0x3d   :  { %s895_s15 = sshra.s32 %s102_s13, 4  ;;  %s896_s15 = int_to_ptr.hbm [resolvable:$true] %s895_s15 }
  0x3e   :  { %s897_s17 = scalar_lea.hbm %s896_s15, 1  ;;  %p900_p7 = scmp.lt.s32.totalorder %s896_s15, %s1426_s1 }
  0x3f   :  { %p898_p6 = scmp.ne.s32.totalorder %s896_s15, %s897_s17  ;;  %p901_p8 = scmp.lt.s32.totalorder %s1270_s6, %s897_s17 }
  0x41   :  { %p902_p9 = por %p901_p8, %p900_p7 }
  0x43   :  { %p903_p10 = pnand %p902_p9, %p898_p6 }
  0x45   :  { %906 = shalt.err (!%p903_p10)  }
  0x46   :  { %106 = dma.hbm_to_vmem [thread:$0]  %s102_s13, 16, %s104_s20, [#allocation3] }
  0x47   :  { %s108_s24 = scalar_lea.hbm %s1426_s1, %s738_s5  ;;  %s124_s21 = scalar_lea.hbm %s1426_s1, %s739_s9 }
  0x48   :  { %s117_s25 = sshll.u32 %s108_s24, 4  ;;  %s133_s27 = sshll.u32 %s124_s21, 4  ;;  %s118_s25 = int_to_ptr.hbm [resolvable:$true] %s117_s25  ;;  %s134_s27 = int_to_ptr.hbm [resolvable:$true] %s133_s27 }
  0x49   :  { %s919_s28 = sshra.s32 %s118_s25, 4  ;;  %s920_s28 = int_to_ptr.hbm [resolvable:$true] %s919_s28 }
  0x4a   :  { %s921_s29 = scalar_lea.hbm %s920_s28, 1  ;;  %p924_p12 = scmp.lt.s32.totalorder %s920_s28, %s1426_s1 }
  0x4b   :  { %p922_p11 = scmp.ne.s32.totalorder %s920_s28, %s921_s29  ;;  %p925_p13 = scmp.lt.s32.totalorder %s1270_s6, %s921_s29 }
  0x4d   :  { %p926_p0 = por %p925_p13, %p924_p12 }
  0x4f   :  { %p927_p1 = pnand %p926_p0, %p922_p11 }
  0x51   :  { %930 = shalt.err (!%p927_p1)  }
  0x52   :  { %122 = dma.hbm_to_vmem [thread:$0]  %s118_s25, 16, %s120_s8, [#allocation3] }
  0x53   :  { %s740_s4 = sld [smem:[#allocation5 + $0x7]]  ;;  %s943_s20 = sshra.s32 %s134_s27, 4  ;;  %s944_s20 = int_to_ptr.hbm [resolvable:$true] %s943_s20 }
  0x54   :  { %s945_s5 = scalar_lea.hbm %s944_s20, 1  ;;  %p948_p3 = scmp.lt.s32.totalorder %s944_s20, %s1426_s1 }
  0x55   :  { %p946_p2 = scmp.ne.s32.totalorder %s944_s20, %s945_s5  ;;  %p949_p4 = scmp.lt.s32.totalorder %s1270_s6, %s945_s5 }
  0x57   :  { %p950_p5 = por %p949_p4, %p948_p3 }
  0x59   :  { %p951_p6 = pnand %p950_p5, %p946_p2 }
  0x5b   :  { %954 = shalt.err (!%p951_p6)  }
  0x5c   :  { %138 = dma.hbm_to_vmem [thread:$0]  %s134_s27, 16, %s136_s16, [#allocation3] }
  0x5d   :  { %s741_s10 = sld [smem:[#allocation5 + $0x8]]  ;;  %s1221_s11 = smov [#allocation2 + $0x7]  }
  0x5e   :  { %s151_s12 = sshll.u32 %s1221_s11, 4  ;;  %s1222_s8 = smov [#allocation2 + $0x8]   ;;  %s152_s12 = int_to_ptr.vmem [resolvable:$true] %s151_s12 }
  0x5f   :  { %s1329_s13 = sshll.u32 %s1222_s8, 4  ;;  %s1332_s14 = sld [smem:[#allocation5 + $0x9]]  ;;  %s168_s13 = int_to_ptr.vmem [resolvable:$true] %s1329_s13 }
  0x60   :  { %s140_s19 = scalar_lea.hbm %s1426_s1, %s740_s4  ;;  %s1223_s22 = smov [#allocation2 + $0x9]  }
  0x61   :  { %s149_s0 = sshll.u32 %s140_s19, 4  ;;  %s1337_s23 = sshll.u32 %s1223_s22, 4  ;;  %s150_s0 = int_to_ptr.hbm [resolvable:$true] %s149_s0  ;;  %s184_s23 = int_to_ptr.vmem [resolvable:$true] %s1337_s23 }
  0x62   :  { %s967_s26 = sshra.s32 %s150_s0, 4  ;;  %s968_s26 = int_to_ptr.hbm [resolvable:$true] %s967_s26 }
  0x63   :  { %s156_s25 = scalar_lea.hbm %s1426_s1, %s741_s10  ;;  %s969_s18 = scalar_lea.hbm %s968_s26, 1 }
  0x64   :  { %p970_p7 = scmp.ne.s32.totalorder %s968_s26, %s969_s18  ;;  %p972_p8 = scmp.lt.s32.totalorder %s968_s26, %s1426_s1 }
  0x65   :  { %p973_p9 = scmp.lt.s32.totalorder %s1270_s6, %s969_s18 }
  0x67   :  { %p974_p10 = por %p973_p9, %p972_p8 }
  0x69   :  { %p975_p11 = pnand %p974_p10, %p970_p7 }
  0x6b   :  { %978 = shalt.err (!%p975_p11)  }
  0x6c   :  { %154 = dma.hbm_to_vmem [thread:$0]  %s150_s0, 16, %s152_s12, [#allocation3] }
  0x6d   :  { %s165_s28 = sshll.u32 %s156_s25, 4  ;;  %s172_s3 = scalar_lea.hbm %s1426_s1, %s1332_s14  ;;  %s166_s28 = int_to_ptr.hbm [resolvable:$true] %s165_s28 }
  0x6e   :  { %s991_s4 = sshra.s32 %s166_s28, 4  ;;  %s992_s4 = int_to_ptr.hbm [resolvable:$true] %s991_s4 }
  0x6f   :  { %s993_s20 = scalar_lea.hbm %s992_s4, 1  ;;  %p996_p13 = scmp.lt.s32.totalorder %s992_s4, %s1426_s1 }
  0x70   :  { %p994_p12 = scmp.ne.s32.totalorder %s992_s4, %s993_s20  ;;  %p997_p0 = scmp.lt.s32.totalorder %s1270_s6, %s993_s20 }
  0x72   :  { %p998_p1 = por %p997_p0, %p996_p13 }
  0x74   :  { %p999_p2 = pnand %p998_p1, %p994_p12 }
  0x76   :  { %1002 = shalt.err (!%p999_p2)  }
  0x77   :  { %170 = dma.hbm_to_vmem [thread:$0]  %s166_s28, 16, %s168_s13, [#allocation3] }
  0x78   :  { %s181_s9 = sshll.u32 %s172_s3, 4  ;;  %s743_s10 = sld [smem:[#allocation5 + $0xa]]  ;;  %s182_s9 = int_to_ptr.hbm [resolvable:$true] %s181_s9 }
  0x79   :  { %s1015_s11 = sshra.s32 %s182_s9, 4  ;;  %s1016_s11 = int_to_ptr.hbm [resolvable:$true] %s1015_s11 }
  0x7a   :  { %s1017_s12 = scalar_lea.hbm %s1016_s11, 1  ;;  %p1020_p4 = scmp.lt.s32.totalorder %s1016_s11, %s1426_s1 }
  0x7b   :  { %p1018_p3 = scmp.ne.s32.totalorder %s1016_s11, %s1017_s12  ;;  %p1021_p5 = scmp.lt.s32.totalorder %s1270_s6, %s1017_s12 }
  0x7d   :  { %p1022_p6 = por %p1021_p5, %p1020_p4 }
  0x7f   :  { %p1023_p7 = pnand %p1022_p6, %p1018_p3 }
  0x81   :  { %1026 = shalt.err (!%p1023_p7)  }
  0x82   :  { %186 = dma.hbm_to_vmem [thread:$0]  %s182_s9, 16, %s184_s23, [#allocation3] }
  0x83   :  { %s1224_s15 = smov [#allocation2 + $0xa]   ;;  %s744_s19 = sld [smem:[#allocation5 + $0xb]] }
  0x84   :  { %s199_s17 = sshll.u32 %s1224_s15, 4  ;;  %s1225_s13 = smov [#allocation2 + $0xb]   ;;  %s200_s17 = int_to_ptr.vmem [resolvable:$true] %s199_s17 }
  0x85   :  { %s1361_s0 = sshll.u32 %s1225_s13, 4  ;;  %s745_s22 = sld [smem:[#allocation5 + $0xc]]  ;;  %s216_s0 = int_to_ptr.vmem [resolvable:$true] %s1361_s0 }
  0x86   :  { %s188_s25 = scalar_lea.hbm %s1426_s1, %s743_s10  ;;  %s1226_s18 = smov [#allocation2 + $0xc]  }
  0x87   :  { %s197_s26 = sshll.u32 %s188_s25, 4  ;;  %s1367_s21 = sshll.u32 %s1226_s18, 4  ;;  %s198_s26 = int_to_ptr.hbm [resolvable:$true] %s197_s26  ;;  %s232_s21 = int_to_ptr.vmem [resolvable:$true] %s1367_s21 }
  0x88   :  { %s1039_s23 = sshra.s32 %s198_s26, 4  ;;  %s1040_s23 = int_to_ptr.hbm [resolvable:$true] %s1039_s23 }
  0x89   :  { %s1041_s27 = scalar_lea.hbm %s1040_s23, 1  ;;  %p1044_p9 = scmp.lt.s32.totalorder %s1040_s23, %s1426_s1 }
  0x8a   :  { %p1042_p8 = scmp.ne.s32.totalorder %s1040_s23, %s1041_s27  ;;  %p1045_p10 = scmp.lt.s32.totalorder %s1270_s6, %s1041_s27 }
  0x8c   :  { %p1046_p11 = por %p1045_p10, %p1044_p9 }
  0x8e   :  { %p1047_p12 = pnand %p1046_p11, %p1042_p8 }
  0x90   :  { %1050 = shalt.err (!%p1047_p12)  }
  0x91   :  { %202 = dma.hbm_to_vmem [thread:$0]  %s198_s26, 16, %s200_s17, [#allocation3] }
  0x92   :  { %s204_s4 = scalar_lea.hbm %s1426_s1, %s744_s19  ;;  %s220_s9 = scalar_lea.hbm %s1426_s1, %s745_s22 }
  0x93   :  { %s213_s20 = sshll.u32 %s204_s4, 4  ;;  %s229_s10 = sshll.u32 %s220_s9, 4  ;;  %s214_s20 = int_to_ptr.hbm [resolvable:$true] %s213_s20  ;;  %s230_s10 = int_to_ptr.hbm [resolvable:$true] %s229_s10 }
  0x94   :  { %s1063_s11 = sshra.s32 %s214_s20, 4  ;;  %s1064_s11 = int_to_ptr.hbm [resolvable:$true] %s1063_s11 }
  0x95   :  { %s1065_s12 = scalar_lea.hbm %s1064_s11, 1  ;;  %p1068_p0 = scmp.lt.s32.totalorder %s1064_s11, %s1426_s1 }
  0x96   :  { %p1066_p13 = scmp.ne.s32.totalorder %s1064_s11, %s1065_s12  ;;  %p1069_p1 = scmp.lt.s32.totalorder %s1270_s6, %s1065_s12 }
  0x98   :  { %p1070_p2 = por %p1069_p1, %p1068_p0 }
  0x9a   :  { %p1071_p3 = pnand %p1070_p2, %p1066_p13 }
  0x9c   :  { %1074 = shalt.err (!%p1071_p3)  }
  0x9d   :  { %218 = dma.hbm_to_vmem [thread:$0]  %s214_s20, 16, %s216_s0, [#allocation3] }
  0x9e   :  { %s746_s15 = sld [smem:[#allocation5 + $0xd]]  ;;  %s1087_s17 = sshra.s32 %s230_s10, 4  ;;  %s1088_s17 = int_to_ptr.hbm [resolvable:$true] %s1087_s17 }
  0x9f   :  { %s1089_s19 = scalar_lea.hbm %s1088_s17, 1  ;;  %p1092_p5 = scmp.lt.s32.totalorder %s1088_s17, %s1426_s1 }
  0xa0   :  { %p1090_p4 = scmp.ne.s32.totalorder %s1088_s17, %s1089_s19  ;;  %p1093_p6 = scmp.lt.s32.totalorder %s1270_s6, %s1089_s19 }
  0xa2   :  { %p1094_p7 = por %p1093_p6, %p1092_p5 }
  0xa4   :  { %p1095_p8 = pnand %p1094_p7, %p1090_p4 }
  0xa6   :  { %1098 = shalt.err (!%p1095_p8)  }
  0xa7   :  { %234 = dma.hbm_to_vmem [thread:$0]  %s230_s10, 16, %s232_s21, [#allocation3] }
  0xa8   :  { %s747_s16 = sld [smem:[#allocation5 + $0xe]]  ;;  %s1227_s24 = smov [#allocation2 + $0xd]  }
  0xa9   :  { %s247_s25 = sshll.u32 %s1227_s24, 4  ;;  %s1228_s0 = smov [#allocation2 + $0xe]   ;;  %s248_s25 = int_to_ptr.vmem [resolvable:$true] %s247_s25 }
  0xaa   :  { %s1390_s26 = sshll.u32 %s1228_s0, 4  ;;  %s1393_s18 = sld [smem:[#allocation5 + $0xf]]  ;;  %s264_s26 = int_to_ptr.vmem [resolvable:$true] %s1390_s26 }
  0xab   :  { %s236_s28 = scalar_lea.hbm %s1426_s1, %s746_s15  ;;  %s1229_s30 = smov [#allocation2 + $0xf]  }
  0xac   :  { %s245_s29 = sshll.u32 %s236_s28, 4  ;;  %s1398_s3 = sshll.u32 %s1229_s30, 4  ;;  %s246_s29 = int_to_ptr.hbm [resolvable:$true] %s245_s29  ;;  %s280_s3 = int_to_ptr.vmem [resolvable:$true] %s1398_s3 }
  0xad   :  { %s1111_s5 = sshra.s32 %s246_s29, 4  ;;  %s1112_s5 = int_to_ptr.hbm [resolvable:$true] %s1111_s5 }
  0xae   :  { %s252_s20 = scalar_lea.hbm %s1426_s1, %s747_s16  ;;  %s1113_s7 = scalar_lea.hbm %s1112_s5, 1 }
  0xaf   :  { %p1114_p9 = scmp.ne.s32.totalorder %s1112_s5, %s1113_s7  ;;  %p1116_p10 = scmp.lt.s32.totalorder %s1112_s5, %s1426_s1 }
  0xb0   :  { %p1117_p11 = scmp.lt.s32.totalorder %s1270_s6, %s1113_s7 }
  0xb2   :  { %p1118_p12 = por %p1117_p11, %p1116_p10 }
  0xb4   :  { %p1119_p13 = pnand %p1118_p12, %p1114_p9 }
  0xb6   :  { %1122 = shalt.err (!%p1119_p13)  }
  0xb7   :  { %250 = dma.hbm_to_vmem [thread:$0]  %s246_s29, 16, %s248_s25, [#allocation3] }
  0xb8   :  { %s261_s11 = sshll.u32 %s252_s20, 4  ;;  %s268_s14 = scalar_lea.hbm %s1426_s1, %s1393_s18  ;;  %s262_s11 = int_to_ptr.hbm [resolvable:$true] %s261_s11 }
  0xb9   :  { %s1135_s15 = sshra.s32 %s262_s11, 4  ;;  %s1136_s15 = int_to_ptr.hbm [resolvable:$true] %s1135_s15 }
  0xba   :  { %s1137_s17 = scalar_lea.hbm %s1136_s15, 1  ;;  %p1140_p1 = scmp.lt.s32.totalorder %s1136_s15, %s1426_s1 }
  0xbb   :  { %p1138_p0 = scmp.ne.s32.totalorder %s1136_s15, %s1137_s17  ;;  %p1141_p2 = scmp.lt.s32.totalorder %s1270_s6, %s1137_s17 }
  0xbd   :  { %p1142_p3 = por %p1141_p2, %p1140_p1 }
  0xbf   :  { %p1143_p4 = pnand %p1142_p3, %p1138_p0 }
  0xc1   :  { %1146 = shalt.err (!%p1143_p4)  }
  0xc2   :  { %266 = dma.hbm_to_vmem [thread:$0]  %s262_s11, 16, %s264_s26, [#allocation3] }
  0xc3   :  { %s277_s22 = sshll.u32 %s268_s14, 4  ;;  %s278_s22 = int_to_ptr.hbm [resolvable:$true] %s277_s22 }
  0xc4   :  { %s1159_s16 = sshra.s32 %s278_s22, 4  ;;  %s1160_s16 = int_to_ptr.hbm [resolvable:$true] %s1159_s16 }
  0xc5   :  { %s1161_s24 = scalar_lea.hbm %s1160_s16, 1  ;;  %p1164_p6 = scmp.lt.s32.totalorder %s1160_s16, %s1426_s1 }
  0xc6   :  { %p1162_p5 = scmp.ne.s32.totalorder %s1160_s16, %s1161_s24  ;;  %p1165_p7 = scmp.lt.s32.totalorder %s1270_s6, %s1161_s24 }
  0xc8   :  { %p1166_p8 = por %p1165_p7, %p1164_p6 }
  0xca   :  { %p1167_p9 = pnand %p1166_p8, %p1162_p5 }
  0xcc   :  { %1170 = shalt.err (!%p1167_p9)  }
  0xcd   :  { %282 = dma.hbm_to_vmem [thread:$0]  %s278_s22, 16, %s280_s3, [#allocation3] }
  0xce   :  { %1209 = dma.done.wait [#allocation3], 256 }
  0xcf   :  { %1210 = vsyncadd [#allocation3], 4294967040  ;;  %s1230_s18 = smov [#allocation6]   ;;  %s626_s28 = sshll.u32 %s1427_s2, 4  ;;  %v614_v0 = vld [vmem:[#allocation2] sm:$0xff]  ;;  %v615_v1 = vld [vmem:[#allocation2 + $0x8] sm:$0xff]  ;;  %s627_s28 = int_to_ptr.hbm [resolvable:$true] %s626_s28 }
  0xd0   :  { %s624_s23 = sshll.u32 %s1230_s18, 4  ;;  %v616_v2 = vmul.f32 5.656854, %v614_v0  ;;  %v617_v3 = vmul.f32 5.656854, %v615_v1  ;;  %s1231_s1 = smov 128   ;;  %s625_s23 = int_to_ptr.vmem [resolvable:$true] %s624_s23 }
  0xd1   :  { %s1232_s6 = smov 8  }
  0xd2   :  { %618 = vst [vmem:[#allocation6] sm:$0xff] %v616_v2 }
  0xd3   :  { %619 = vst [vmem:[#allocation6 + $0x8] sm:$0xff] %v617_v3 }
  0xd4   :  { %632 = dma.vmem_to_hbm [thread:$0]  %s625_s23, 256, %s627_s28, [#allocation7], %s1231_s1, %s1231_s1, %s1232_s6  }
  0xd5   :  { %1211 = dma.done.wait [#allocation7], 256  }
  0xd6   :  { %1212 = vsyncadd [#allocation7], 4294967040 }
  0xd7   :  { %637 = vsyncpa [#allocation7], 1 }
  0xd8   :  { %638 = vsyncmov [#allocation3] }
  0xdb   :  { %s639_s29 = vpop.sfrf %638 }
  0xdc   :  { %p765_p10 = scmp.ne.s32.totalorder %s639_s29, 0 }
  0xde   :  { %643 = shalt.err (%p765_p10)  }
  0xdf   :  { %645 = vsyncmov [#allocation3 + $0x1] }
  0xe2   :  { %s646_s2 = vpop.sfrf %645 }
  0xe3   :  { %p766_p11 = scmp.ne.s32.totalorder %s646_s2, 0 }
  0xe5   :  { %650 = shalt.err (%p766_p11)  }

</bundles_post_ra>
